<compile_context>
chip_gen: v7x
topology: tpu7x:2x2x1
jax: 0.10.0
libtpu: 0.0.40
codegen_flags: <defaults>
</compile_context>

<pallas_src>
import functools

import jax
import jax.numpy as jnp
from jax.experimental import pallas as pl
from jax.experimental.pallas import tpu as pltpu


def _attention_kernel(xq_ref, xkv_ref, wq_ref, wk_ref, wv_ref, wo_ref,
                      o_ref, m_sc, l_sc, acc_sc, *, scale, approx_recip):
    # xq_ref : (1, tq, Dp)   query-side activations for this q block
    # xkv_ref: (1, tk, Dp)   key/value-side activations for this k block
    # wq/wk/wv_ref: (H, Dp, dk)   head-major projection weights (VMEM resident)
    # wo_ref : (H, dk, Dp)        head-major output-projection weight
    # o_ref  : (1, tq, Dp)
    # m_sc, l_sc: (H, tq, 1) f32 ; acc_sc: (H, tq, dk) f32
    ki = pl.program_id(2)
    nk = pl.num_programs(2)

    @pl.when(ki == 0)
    def _init():
        m_sc[...] = jnp.full(m_sc.shape, -jnp.inf, dtype=m_sc.dtype)
        l_sc[...] = jnp.zeros(l_sc.shape, dtype=l_sc.dtype)
        acc_sc[...] = jnp.zeros(acc_sc.shape, dtype=acc_sc.dtype)

    H = wq_ref.shape[0]
    cdt = xq_ref.dtype                      # compute (MXU operand) dtype

    xq = xq_ref[0]                          # (tq, Dp)
    xkv = xkv_ref[0]                        # (tk, Dp)

    # Broadcast activations along the head axis so the projections are plain
    # head-batched matmuls (batch dim leading -> direct MXU lowering).
    xq_b = jnp.broadcast_to(xq[None, :, :], (H,) + xq.shape)     # (H, tq, Dp)
    xkv_b = jnp.broadcast_to(xkv[None, :, :], (H,) + xkv.shape)  # (H, tk, Dp)

    # Head-batched QKV projections, f32 accumulation on the MXU.
    q = jnp.einsum("hqd,hde->hqe", xq_b, wq_ref[...],
                   preferred_element_type=jnp.float32)           # (H, tq, dk)
    k = jnp.einsum("hkd,hde->hke", xkv_b, wk_ref[...],
                   preferred_element_type=jnp.float32)           # (H, tk, dk)
    v = jnp.einsum("hkd,hde->hke", xkv_b, wv_ref[...],
                   preferred_element_type=jnp.float32)           # (H, tk, dk)

    q = q * scale                                                # as in the module (q.mul_(scale))

    # Scores: contraction over dk of both operands (no explicit transpose).
    s = jnp.einsum("hqe,hke->hqk", q.astype(cdt), k.astype(cdt),
                   preferred_element_type=jnp.float32)           # (H, tq, tk)

    # Online (flash) softmax update -- statistics kept in f32.
    m_prev = m_sc[...]                                           # (H, tq, 1)
    m_cur = jnp.max(s, axis=-1, keepdims=True)
    m_new = jnp.maximum(m_prev, m_cur)
    alpha = jnp.exp(m_prev - m_new)
    p = jnp.exp(s - m_new)                                       # (H, tq, tk) f32, <= 1
    l_sc[...] = alpha * l_sc[...] + jnp.sum(p, axis=-1, keepdims=True)

    # TODO(synk): dropout_rate > 0 not implemented (module default 0 -> identity).
    pv = jnp.einsum("hqk,hke->hqe", p.astype(cdt), v.astype(cdt),
                    preferred_element_type=jnp.float32)          # (H, tq, dk)
    acc_sc[...] = alpha * acc_sc[...] + pv
    m_sc[...] = m_new

    @pl.when(ki == nk - 1)
    def _finalize():
        # Fold softmax normalization into one reciprocal-multiply epilogue.
        inv_l = pl.reciprocal(l_sc[...], approx=approx_recip)    # (H, tq, 1)
        ctx = (acc_sc[...] * inv_l).astype(cdt)                  # (H, tq, dk)
        # Output projection: per-head matmul then sum over heads == the PyTorch
        # concat(heads) @ W_out (head-major ordering), without any lane concat.
        out_h = jnp.einsum("hqe,hed->hqd", ctx, wo_ref[...],
                           preferred_element_type=jnp.float32)   # (H, tq, Dp)
        out = jnp.sum(out_h, axis=0)                             # (tq, Dp)
        o_ref[0] = out.astype(o_ref.dtype)


def _pick_tile(n, pref=128):
    """Query/key block size: 128 when it divides S, else the full extent."""
    return pref if n % pref == 0 else n


def self_attention(x, w_qkv, w_out, *, head_size, compute_dtype=jnp.bfloat16):
    """x: (B, S, D); w_qkv: (D, 3*H*dk); w_out: (H*dk, D)."""
    B, S, D = x.shape
    H = head_size
    dk = w_qkv.shape[1] // (3 * H)
    assert w_qkv.shape[1] == 3 * H * dk and w_out.shape == (H * dk, D)
    scale = float(dk) ** (-0.5)

    # ---- wrapper-side weight reordering (one-time, free at runtime) --------
    # PyTorch view(B, S, 3, H, dk): the 3*H*dk output axis is (three, head, dk)
    # with `three` slowest.  Split and make the head axis leading.
    wqkv_r = w_qkv.reshape(D, 3, H, dk)
    wq = jnp.transpose(wqkv_r[:, 0], (1, 0, 2))                  # (H, D, dk)
    wk = jnp.transpose(wqkv_r[:, 1], (1, 0, 2))
    wv = jnp.transpose(wqkv_r[:, 2], (1, 0, 2))
    wo = w_out.reshape(H, dk, D)                                 # (H, dk, D)

    # ---- pad hidden dim to a lane-dense multiple of 128 ---------------------
    Dp = max(128, ((D + 127) // 128) * 128)
    pad = Dp - D
    if pad:
        x_p = jnp.pad(x, ((0, 0), (0, 0), (0, pad)))
        wq = jnp.pad(wq, ((0, 0), (0, pad), (0, 0)))
        wk = jnp.pad(wk, ((0, 0), (0, pad), (0, 0)))
        wv = jnp.pad(wv, ((0, 0), (0, pad), (0, 0)))
        wo = jnp.pad(wo, ((0, 0), (0, 0), (0, pad)))
    else:
        x_p = x

    # ---- MXU operand dtype (bf16 on v6e/v7x; f32 accumulation in-kernel) ----
    x_c = x_p.astype(compute_dtype)
    wq, wk, wv, wo = (w.astype(compute_dtype) for w in (wq, wk, wv, wo))

    tq = _pick_tile(S)
    tk = _pick_tile(S)
    nq = S // tq
    nk = S // tk

    # ---- explicit VMEM budget (v7x has only 64 MiB/TC) ----------------------
    itemsize = jnp.dtype(compute_dtype).itemsize
    w_bytes = (3 * H * Dp * dk + H * dk * Dp) * itemsize
    tile_bytes = 2 * (tq + tk) * Dp * itemsize                   # double-buffered x tiles
    out_bytes = 2 * tq * Dp * jnp.dtype(x.dtype).itemsize
    scr_bytes = H * tq * (dk + 2) * 4
    est = 2 * w_bytes + tile_bytes + out_bytes + scr_bytes
    vmem_limit = int(min(64 * 1024 * 1024, max(32 * 1024 * 1024, 2 * est)))

    kernel = functools.partial(
        _attention_kernel,
        scale=scale,
        approx_recip=(jnp.dtype(compute_dtype) != jnp.dtype(jnp.float32)),
    )

    out_p = pl.pallas_call(
        kernel,
        out_shape=jax.ShapeDtypeStruct((B, S, Dp), x.dtype),
        grid_spec=pltpu.PrefetchScalarGridSpec(
            num_scalar_prefetch=0,
            grid=(B, nq, nk),
            in_specs=[
                pl.BlockSpec((1, tq, Dp), lambda b, qi, ki: (b, qi, 0)),   # x (query side)
                pl.BlockSpec((1, tk, Dp), lambda b, qi, ki: (b, ki, 0)),   # x (key/value side)
                pl.BlockSpec((H, Dp, dk), lambda b, qi, ki: (0, 0, 0)),    # Wq (resident)
                pl.BlockSpec((H, Dp, dk), lambda b, qi, ki: (0, 0, 0)),    # Wk (resident)
                pl.BlockSpec((H, Dp, dk), lambda b, qi, ki: (0, 0, 0)),    # Wv (resident)
                pl.BlockSpec((H, dk, Dp), lambda b, qi, ki: (0, 0, 0)),    # Wout (resident)
            ],
            out_specs=pl.BlockSpec((1, tq, Dp), lambda b, qi, ki: (b, qi, 0)),
            scratch_shapes=[
                pltpu.VMEM((H, tq, 1), jnp.float32),    # running max  m
                pltpu.VMEM((H, tq, 1), jnp.float32),    # running sum  l
                pltpu.VMEM((H, tq, dk), jnp.float32),   # output accumulator
            ],
        ),
        compiler_params=pltpu.CompilerParams(
            dimension_semantics=("parallel", "parallel", "arbitrary"),
            vmem_limit_bytes=vmem_limit,
        ),
    )(x_c, x_c, wq, wk, wv, wo)

    return out_p[..., :D]


def self_attention_ref(x, w_qkv, w_out, *, head_size):
    """Plain-JAX replica of the PyTorch forward (for verification)."""
    B, S, D = x.shape
    dk = w_qkv.shape[1] // (3 * head_size)
    scale = float(dk) ** (-0.5)
    qkv = x @ w_qkv                                              # (B, S, 3*H*dk)
    qkv = qkv.reshape(B, S, 3, head_size, dk)
    qkv = jnp.transpose(qkv, (0, 3, 2, 1, 4))                    # (B, H, 3, S, dk)
    q, k, v = qkv[:, :, 0], qkv[:, :, 1], qkv[:, :, 2]
    q = q * scale
    att = jnp.einsum("bhqd,bhkd->bhqk", q, k)
    att = jax.nn.softmax(att, axis=-1)
    ctx = jnp.einsum("bhqk,bhkd->bhqd", att, v)
    ctx = jnp.transpose(ctx, (0, 2, 1, 3)).reshape(B, S, head_size * dk)
    return ctx @ w_out


if __name__ == "__main__":
    # Small shapes consistent with the module.
    B, S, hidden_size, head_size = 2, 8, 32, 4
    att_size = hidden_size // head_size

    key = jax.random.PRNGKey(0)
    kx, kq, ko = jax.random.split(key, 3)

    x = jax.random.normal(kx, (B, S, hidden_size), dtype=jnp.float32)
    # Deterministic synthetic weights (stand-in for initialize_weight), stored
    # as (in_features, out_features).
    w_qkv = 0.05 * jax.random.normal(
        kq, (hidden_size, 3 * head_size * att_size), dtype=jnp.float32)
    w_out = 0.05 * jax.random.normal(
        ko, (head_size * att_size, hidden_size), dtype=jnp.float32)

    ref = self_attention_ref(x, w_qkv, w_out, head_size=head_size)

    # f32-operand path: strict check against the reference.
    out_f32 = jax.block_until_ready(
        self_attention(x, w_qkv, w_out, head_size=head_size,
                       compute_dtype=jnp.float32))
    assert out_f32.shape == (B, S, hidden_size)
    assert jnp.allclose(out_f32, ref, atol=1e-4, rtol=1e-4), \
        "f32 kernel mismatch vs reference"

    # bf16-operand path (production config on v6e/v7x): relaxed tolerance.
    out_bf16 = jax.block_until_ready(
        self_attention(x, w_qkv, w_out, head_size=head_size,
                       compute_dtype=jnp.bfloat16))
    assert out_bf16.shape == (B, S, hidden_size)
    assert jnp.allclose(out_bf16.astype(jnp.float32), ref,
                        atol=5e-2, rtol=5e-2), "bf16 kernel mismatch vs reference"

    print("KERNEL_OK")
</pallas_src>

<mosaic_0001>
module attributes {stable_mosaic.version = 11 : i64} {
  func.func @_attention_kernel(%arg0: i32, %arg1: i32, %arg2: i32, %arg3: memref<1x8x128xf32, #tpu.memory_space<vmem>>, %arg4: memref<1x8x128xf32, #tpu.memory_space<vmem>>, %arg5: memref<4x128x8xf32, #tpu.memory_space<vmem>>, %arg6: memref<4x128x8xf32, #tpu.memory_space<vmem>>, %arg7: memref<4x128x8xf32, #tpu.memory_space<vmem>>, %arg8: memref<4x8x128xf32, #tpu.memory_space<vmem>>, %arg9: memref<1x8x128xf32, #tpu.memory_space<vmem>>, %arg10: memref<4x8x1xf32, #tpu.memory_space<vmem>>, %arg11: memref<4x8x1xf32, #tpu.memory_space<vmem>>, %arg12: memref<4x8x8xf32, #tpu.memory_space<vmem>>) attributes {dimension_semantics = [#tpu.dimension_semantics<parallel>, #tpu.dimension_semantics<parallel>, #tpu.dimension_semantics<arbitrary>], iteration_bounds = array<i64: 2, 1, 1>, scalar_prefetch = 0 : i64, scratch_operands = 3 : i64, tpu.core_type = #tpu.core_type<tc>, window_params = [{transform_indices = @transform_0, window_bounds = array<i64: 1, 8, 128>}, {transform_indices = @transform_1, window_bounds = array<i64: 1, 8, 128>}, {pipeline_mode = #tpu.pipeline_mode<synchronous>, transform_indices = @transform_2, window_bounds = array<i64: 4, 128, 8>}, {pipeline_mode = #tpu.pipeline_mode<synchronous>, transform_indices = @transform_3, window_bounds = array<i64: 4, 128, 8>}, {pipeline_mode = #tpu.pipeline_mode<synchronous>, transform_indices = @transform_4, window_bounds = array<i64: 4, 128, 8>}, {pipeline_mode = #tpu.pipeline_mode<synchronous>, transform_indices = @transform_5, window_bounds = array<i64: 4, 8, 128>}, {transform_indices = @transform_6, window_bounds = array<i64: 1, 8, 128>}]} {
    %c0_i32 = arith.constant 0 : i32
    %0 = arith.cmpi eq, %arg2, %c0_i32 : i32
    %1 = arith.extui %0 : i1 to i32
    %c0_i32_0 = arith.constant 0 : i32
    %2 = arith.cmpi ne, %1, %c0_i32_0 : i32
    scf.if %2 {
      %cst_42 = arith.constant 0xFF800000 : f32
      %47 = vector.broadcast %cst_42 : f32 to vector<4x8x1xf32>
      %c0_43 = arith.constant 0 : index
      %c0_44 = arith.constant 0 : index
      %c0_45 = arith.constant 0 : index
      %48 = vector.load %arg10[%c0_43, %c0_44, %c0_45] : memref<4x8x1xf32, #tpu.memory_space<vmem>>, vector<4x8x1xf32>
      tpu.vector_store %arg10[%c0_43, %c0_44, %c0_45], %47 {strides = array<i32>} : memref<4x8x1xf32, #tpu.memory_space<vmem>>, vector<4x8x1xf32>,
      %cst_46 = arith.constant 0.000000e+00 : f32
      %49 = vector.broadcast %cst_46 : f32 to vector<4x8x1xf32>
      %c0_47 = arith.constant 0 : index
      %c0_48 = arith.constant 0 : index
      %c0_49 = arith.constant 0 : index
      %50 = vector.load %arg11[%c0_47, %c0_48, %c0_49] : memref<4x8x1xf32, #tpu.memory_space<vmem>>, vector<4x8x1xf32>
      tpu.vector_store %arg11[%c0_47, %c0_48, %c0_49], %49 {strides = array<i32>} : memref<4x8x1xf32, #tpu.memory_space<vmem>>, vector<4x8x1xf32>,
      %cst_50 = arith.constant 0.000000e+00 : f32
      %51 = vector.broadcast %cst_50 : f32 to vector<4x8x8xf32>
      %c0_51 = arith.constant 0 : index
      %c0_52 = arith.constant 0 : index
      %c0_53 = arith.constant 0 : index
      %52 = vector.load %arg12[%c0_51, %c0_52, %c0_53] : memref<4x8x8xf32, #tpu.memory_space<vmem>>, vector<4x8x8xf32>
      tpu.vector_store %arg12[%c0_51, %c0_52, %c0_53], %51 {strides = array<i32>} : memref<4x8x8xf32, #tpu.memory_space<vmem>>, vector<4x8x8xf32>,
    } else {
    }
    %c0 = arith.constant 0 : index
    %c0_1 = arith.constant 0 : index
    %c0_2 = arith.constant 0 : index
    %3 = vector.load %arg3[%c0, %c0_1, %c0_2] : memref<1x8x128xf32, #tpu.memory_space<vmem>>, vector<1x8x128xf32>
    %4 = vector.shape_cast %3 : vector<1x8x128xf32> to vector<8x128xf32>
    %c0_3 = arith.constant 0 : index
    %c0_4 = arith.constant 0 : index
    %c0_5 = arith.constant 0 : index
    %5 = vector.load %arg4[%c0_3, %c0_4, %c0_5] : memref<1x8x128xf32, #tpu.memory_space<vmem>>, vector<1x8x128xf32>
    %6 = vector.shape_cast %5 : vector<1x8x128xf32> to vector<8x128xf32>
    %7 = vector.shape_cast %4 : vector<8x128xf32> to vector<1x8x128xf32>
    %8 = vector.shape_cast %7 : vector<1x8x128xf32> to vector<1x8x128xf32>
    %9 = vector.broadcast %8 : vector<1x8x128xf32> to vector<4x8x128xf32>
    %10 = vector.shape_cast %6 : vector<8x128xf32> to vector<1x8x128xf32>
    %11 = vector.shape_cast %10 : vector<1x8x128xf32> to vector<1x8x128xf32>
    %12 = vector.broadcast %11 : vector<1x8x128xf32> to vector<4x8x128xf32>
    %c0_6 = arith.constant 0 : index
    %c0_7 = arith.constant 0 : index
    %c0_8 = arith.constant 0 : index
    %13 = vector.load %arg5[%c0_6, %c0_7, %c0_8] : memref<4x128x8xf32, #tpu.memory_space<vmem>>, vector<4x128x8xf32>
    "tpu.trace_start"() <{level = 10 : i32, message = "hqd,hde->hqe"}> : () -> ()
    %cst = arith.constant dense<0.000000e+00> : vector<4x8x8xf32>
    %14 = tpu.matmul %9, %13, %cst {dimension_numbers = #tpu.dot_dimension_numbers<[2], [1], [1], [2], [0, 0, 0, 1, 1, 2], [0], [0]>} : vector<4x8x128xf32>, vector<4x128x8xf32>, vector<4x8x8xf32> -> vector<4x8x8xf32>
    "tpu.trace_stop"() : () -> ()
    %c0_9 = arith.constant 0 : index
    %c0_10 = arith.constant 0 : index
    %c0_11 = arith.constant 0 : index
    %15 = vector.load %arg6[%c0_9, %c0_10, %c0_11] : memref<4x128x8xf32, #tpu.memory_space<vmem>>, vector<4x128x8xf32>
    "tpu.trace_start"() <{level = 10 : i32, message = "hkd,hde->hke"}> : () -> ()
    %cst_12 = arith.constant dense<0.000000e+00> : vector<4x8x8xf32>
    %16 = tpu.matmul %12, %15, %cst_12 {dimension_numbers = #tpu.dot_dimension_numbers<[2], [1], [1], [2], [0, 0, 0, 1, 1, 2], [0], [0]>} : vector<4x8x128xf32>, vector<4x128x8xf32>, vector<4x8x8xf32> -> vector<4x8x8xf32>
    "tpu.trace_stop"() : () -> ()
    %c0_13 = arith.constant 0 : index
    %c0_14 = arith.constant 0 : index
    %c0_15 = arith.constant 0 : index
    %17 = vector.load %arg7[%c0_13, %c0_14, %c0_15] : memref<4x128x8xf32, #tpu.memory_space<vmem>>, vector<4x128x8xf32>
    "tpu.trace_start"() <{level = 10 : i32, message = "hkd,hde->hke"}> : () -> ()
    %cst_16 = arith.constant dense<0.000000e+00> : vector<4x8x8xf32>
    %18 = tpu.matmul %12, %17, %cst_16 {dimension_numbers = #tpu.dot_dimension_numbers<[2], [1], [1], [2], [0, 0, 0, 1, 1, 2], [0], [0]>} : vector<4x8x128xf32>, vector<4x128x8xf32>, vector<4x8x8xf32> -> vector<4x8x8xf32>
    "tpu.trace_stop"() : () -> ()
    %cst_17 = arith.constant 0.353553385 : f32
    %19 = vector.broadcast %cst_17 : f32 to vector<4x8x8xf32>
    %20 = arith.mulf %14, %19 : vector<4x8x8xf32>
    "tpu.trace_start"() <{level = 10 : i32, message = "hqe,hke->hqk"}> : () -> ()
    %cst_18 = arith.constant dense<0.000000e+00> : vector<4x8x8xf32>
    %21 = tpu.matmul %20, %16, %cst_18 {dimension_numbers = #tpu.dot_dimension_numbers<[2], [2], [1], [1], [0, 0, 0, 1, 1, 1], [0], [0]>} : vector<4x8x8xf32>, vector<4x8x8xf32>, vector<4x8x8xf32> -> vector<4x8x8xf32>
    "tpu.trace_stop"() : () -> ()
    %c0_19 = arith.constant 0 : index
    %c0_20 = arith.constant 0 : index
    %c0_21 = arith.constant 0 : index
    %22 = vector.load %arg10[%c0_19, %c0_20, %c0_21] : memref<4x8x1xf32, #tpu.memory_space<vmem>>, vector<4x8x1xf32>
    %cst_22 = arith.constant dense<0xFF800000> : vector<4x8xf32>
    %23 = vector.multi_reduction <maximumf>, %21, %cst_22 [2] : vector<4x8x8xf32> to vector<4x8xf32>
    %24 = vector.shape_cast %23 : vector<4x8xf32> to vector<4x8x1xf32>
    %25 = arith.maximumf %22, %24 : vector<4x8x1xf32>
    %26 = arith.subf %22, %25 : vector<4x8x1xf32>
    %27 = math.exp %26 : vector<4x8x1xf32>
    %28 = vector.broadcast %25 : vector<4x8x1xf32> to vector<4x8x8xf32>
    %29 = arith.subf %21, %28 : vector<4x8x8xf32>
    %30 = math.exp %29 : vector<4x8x8xf32>
    %c0_23 = arith.constant 0 : index
    %c0_24 = arith.constant 0 : index
    %c0_25 = arith.constant 0 : index
    %31 = vector.load %arg11[%c0_23, %c0_24, %c0_25] : memref<4x8x1xf32, #tpu.memory_space<vmem>>, vector<4x8x1xf32>
    %32 = arith.mulf %27, %31 : vector<4x8x1xf32>
    %cst_26 = arith.constant dense<0.000000e+00> : vector<4x8xf32>
    %33 = vector.multi_reduction <add>, %30, %cst_26 [2] : vector<4x8x8xf32> to vector<4x8xf32>
    %34 = vector.shape_cast %33 : vector<4x8xf32> to vector<4x8x1xf32>
    %35 = arith.addf %32, %34 : vector<4x8x1xf32>
    %c0_27 = arith.constant 0 : index
    %c0_28 = arith.constant 0 : index
    %c0_29 = arith.constant 0 : index
    %36 = vector.load %arg11[%c0_27, %c0_28, %c0_29] : memref<4x8x1xf32, #tpu.memory_space<vmem>>, vector<4x8x1xf32>
    tpu.vector_store %arg11[%c0_27, %c0_28, %c0_29], %35 {strides = array<i32>} : memref<4x8x1xf32, #tpu.memory_space<vmem>>, vector<4x8x1xf32>,
    "tpu.trace_start"() <{level = 10 : i32, message = "hqk,hke->hqe"}> : () -> ()
    %cst_30 = arith.constant dense<0.000000e+00> : vector<4x8x8xf32>
    %37 = tpu.matmul %30, %18, %cst_30 {dimension_numbers = #tpu.dot_dimension_numbers<[2], [1], [1], [2], [0, 0, 0, 1, 1, 2], [0], [0]>} : vector<4x8x8xf32>, vector<4x8x8xf32>, vector<4x8x8xf32> -> vector<4x8x8xf32>
    "tpu.trace_stop"() : () -> ()
    %c0_31 = arith.constant 0 : index
    %c0_32 = arith.constant 0 : index
    %c0_33 = arith.constant 0 : index
    %38 = vector.load %arg12[%c0_31, %c0_32, %c0_33] : memref<4x8x8xf32, #tpu.memory_space<vmem>>, vector<4x8x8xf32>
    %39 = vector.broadcast %27 : vector<4x8x1xf32> to vector<4x8x8xf32>
    %40 = arith.mulf %39, %38 : vector<4x8x8xf32>
    %41 = arith.addf %40, %37 : vector<4x8x8xf32>
    %c0_34 = arith.constant 0 : index
    %c0_35 = arith.constant 0 : index
    %c0_36 = arith.constant 0 : index
    %42 = vector.load %arg12[%c0_34, %c0_35, %c0_36] : memref<4x8x8xf32, #tpu.memory_space<vmem>>, vector<4x8x8xf32>
    tpu.vector_store %arg12[%c0_34, %c0_35, %c0_36], %41 {strides = array<i32>} : memref<4x8x8xf32, #tpu.memory_space<vmem>>, vector<4x8x8xf32>,
    %c0_37 = arith.constant 0 : index
    %c0_38 = arith.constant 0 : index
    %c0_39 = arith.constant 0 : index
    %43 = vector.load %arg10[%c0_37, %c0_38, %c0_39] : memref<4x8x1xf32, #tpu.memory_space<vmem>>, vector<4x8x1xf32>
    tpu.vector_store %arg10[%c0_37, %c0_38, %c0_39], %25 {strides = array<i32>} : memref<4x8x1xf32, #tpu.memory_space<vmem>>, vector<4x8x1xf32>,
    %c0_i32_40 = arith.constant 0 : i32
    %44 = arith.cmpi eq, %arg2, %c0_i32_40 : i32
    %45 = arith.extui %44 : i1 to i32
    %c0_i32_41 = arith.constant 0 : i32
    %46 = arith.cmpi ne, %45, %c0_i32_41 : i32
    scf.if %46 {
      %c0_42 = arith.constant 0 : index
      %c0_43 = arith.constant 0 : index
      %c0_44 = arith.constant 0 : index
      %47 = vector.load %arg11[%c0_42, %c0_43, %c0_44] : memref<4x8x1xf32, #tpu.memory_space<vmem>>, vector<4x8x1xf32>
      %48 = tpu.reciprocal %47 : vector<4x8x1xf32> -> vector<4x8x1xf32>
      %c0_45 = arith.constant 0 : index
      %c0_46 = arith.constant 0 : index
      %c0_47 = arith.constant 0 : index
      %49 = vector.load %arg12[%c0_45, %c0_46, %c0_47] : memref<4x8x8xf32, #tpu.memory_space<vmem>>, vector<4x8x8xf32>
      %50 = vector.broadcast %48 : vector<4x8x1xf32> to vector<4x8x8xf32>
      %51 = arith.mulf %49, %50 : vector<4x8x8xf32>
      %c0_48 = arith.constant 0 : index
      %c0_49 = arith.constant 0 : index
      %c0_50 = arith.constant 0 : index
      %52 = vector.load %arg8[%c0_48, %c0_49, %c0_50] : memref<4x8x128xf32, #tpu.memory_space<vmem>>, vector<4x8x128xf32>
      "tpu.trace_start"() <{level = 10 : i32, message = "hqe,hed->hqd"}> : () -> ()
      %cst_51 = arith.constant dense<0.000000e+00> : vector<4x8x128xf32>
      %53 = tpu.matmul %51, %52, %cst_51 {dimension_numbers = #tpu.dot_dimension_numbers<[2], [1], [1], [2], [0, 0, 0, 1, 1, 2], [0], [0]>} : vector<4x8x8xf32>, vector<4x8x128xf32>, vector<4x8x128xf32> -> vector<4x8x128xf32>
      "tpu.trace_stop"() : () -> ()
      %cst_52 = arith.constant dense<0.000000e+00> : vector<8x128xf32>
      %54 = vector.multi_reduction <add>, %53, %cst_52 [0] : vector<4x8x128xf32> to vector<8x128xf32>
      %c0_53 = arith.constant 0 : index
      %c0_54 = arith.constant 0 : index
      %c0_55 = arith.constant 0 : index
      %55 = vector.load %arg9[%c0_53, %c0_54, %c0_55] : memref<1x8x128xf32, #tpu.memory_space<vmem>>, vector<1x8x128xf32>
      %56 = vector.shape_cast %55 : vector<1x8x128xf32> to vector<8x128xf32>
      %57 = vector.shape_cast %54 : vector<8x128xf32> to vector<1x8x128xf32>
      tpu.vector_store %arg9[%c0_53, %c0_54, %c0_55], %57 {strides = array<i32>} : memref<1x8x128xf32, #tpu.memory_space<vmem>>, vector<1x8x128xf32>,
    } else {
    }
    return
  }
  func.func @transform_0(%arg0: i32, %arg1: i32, %arg2: i32) -> (i32, i32, i32) {
    %c0_i32 = arith.constant 0 : i32
    %c0_i32_0 = arith.constant 0 : i32
    return %arg0, %arg1, %c0_i32 : i32, i32, i32
  }
  func.func @transform_1(%arg0: i32, %arg1: i32, %arg2: i32) -> (i32, i32, i32) {
    %c0_i32 = arith.constant 0 : i32
    %c0_i32_0 = arith.constant 0 : i32
    return %arg0, %arg2, %c0_i32 : i32, i32, i32
  }
  func.func @transform_2(%arg0: i32, %arg1: i32, %arg2: i32) -> (i32, i32, i32) {
    %c0_i32 = arith.constant 0 : i32
    %c0_i32_0 = arith.constant 0 : i32
    %c0_i32_1 = arith.constant 0 : i32
    %c0_i32_2 = arith.constant 0 : i32
    return %c0_i32, %c0_i32_0, %c0_i32_1 : i32, i32, i32
  }
  func.func @transform_3(%arg0: i32, %arg1: i32, %arg2: i32) -> (i32, i32, i32) {
    %c0_i32 = arith.constant 0 : i32
    %c0_i32_0 = arith.constant 0 : i32
    %c0_i32_1 = arith.constant 0 : i32
    %c0_i32_2 = arith.constant 0 : i32
    return %c0_i32, %c0_i32_0, %c0_i32_1 : i32, i32, i32
  }
  func.func @transform_4(%arg0: i32, %arg1: i32, %arg2: i32) -> (i32, i32, i32) {
    %c0_i32 = arith.constant 0 : i32
    %c0_i32_0 = arith.constant 0 : i32
    %c0_i32_1 = arith.constant 0 : i32
    %c0_i32_2 = arith.constant 0 : i32
    return %c0_i32, %c0_i32_0, %c0_i32_1 : i32, i32, i32
  }
  func.func @transform_5(%arg0: i32, %arg1: i32, %arg2: i32) -> (i32, i32, i32) {
    %c0_i32 = arith.constant 0 : i32
    %c0_i32_0 = arith.constant 0 : i32
    %c0_i32_1 = arith.constant 0 : i32
    %c0_i32_2 = arith.constant 0 : i32
    return %c0_i32, %c0_i32_0, %c0_i32_1 : i32, i32, i32
  }
  func.func @transform_6(%arg0: i32, %arg1: i32, %arg2: i32) -> (i32, i32, i32) {
    %c0_i32 = arith.constant 0 : i32
    %c0_i32_0 = arith.constant 0 : i32
    return %arg0, %arg1, %c0_i32 : i32, i32, i32
  }
}

</mosaic_0001>

<bundles_post_ra>
// kernel: tpu_custom_call.1
= control target key start
LH: loop header
LB: loop body
LE: loop exit
PB: predicated region body
PF: predicated region fallthrough
CT: control target
= control target key end

     0   :  { %11 = vsyncpa [#allocation6], 0  ;;  %s4746_s0 = inlined_call_operand.vmem [shape: f32[2,8,128], index: 0, kind: input, shape index: {}]   ;;  %s4747_s1 = inlined_call_operand.vmem [shape: f32[2,8,128], index: 1, kind: input, shape index: {}]   ;;  %s4748_s2 = inlined_call_operand.vmem [shape: f32[4,128,8], index: 2, kind: input, shape index: {}]   ;;  %s4749_s3 = inlined_call_operand.vmem [shape: f32[4,128,8], index: 3, kind: input, shape index: {}]   ;;  %s4750_s4 = inlined_call_operand.vmem [shape: f32[4,128,8], index: 4, kind: input, shape index: {}]   ;;  %s4751_s5 = inlined_call_operand.vmem [shape: f32[4,8,128], index: 5, kind: input, shape index: {}]   ;;  %s4752_s6 = inlined_call_operand.hbm [shape: f32[2,8,128], index: 6, kind: output, shape index: {}]  }
   0x1   :  { %13 = vsyncpa [#allocation6 + $0x1], 0  ;;  %s3773_s21 = smov 0   ;;  %s3775_s22 = smov 0  }
   0x2   :  { %s3777_s23 = smov 0   ;;  %s3779_s24 = smov 0  }
   0x3   :  { %s3781_s25 = smov 0   ;;  %s3783_s26 = smov 0  }
   0x4 LB: > { %s2536_s27 = sadd.s32 4294967295, %s3730_s26   ;;  %s2537_s28 = sadd.s32 4294967294, %s3730_s26   ;;  %s3730_s26 = sphi %s3783_s26, %s19_s26   ;;  %s3726_s25 = sphi %s3781_s25, %s4759_s25   ;;  %s3722_s24 = sphi %s3779_s24, %s4758_s24   ;;  %s3718_s23 = sphi %s3777_s23, %s4757_s23   ;;  %s3714_s22 = sphi %s3775_s22, %s4756_s22   ;;  %s3710_s21 = sphi %s3773_s21, %s4755_s21  }
   0x5   : > { %s38_s29 = sadd.s32 1, %s3726_s25  ;;  %s187_s30 = sadd.s32 1, %s3718_s23 }
   0x6   : > { %p40_p0 = scmp.ge.s32.totalorder %s38_s29, 2  ;;  %p197_p1 = scmp.ne.s32.totalorder %s3718_s23, %s3714_s22 }
   0x7   : > { %p198_p2 = scmp.eq.s32.totalorder %s2536_s27, 1  ;;  %p203_p3 = scmp.ne.s32.totalorder %s3714_s22, %s3710_s21 }
   0x8   : > { %s4761_s29 = smov (%p40_p0, %s38_s29), 0  ;;  %p204_p5 = scmp.eq.s32.totalorder %s2537_s28, 1 }
   0x9   : > { %p3813_p4 = por %p198_p2, %p197_p1  ;;  %s182_s8 = ssub.s32 %s3726_s25, %s4761_s29 }
   0xa   : > { %p2540_p6 = scmp.ge.s32.totalorder %s3730_s26, 1  ;;  %p185_p7 = scmp.eq.s32.totalorder %s182_s8, 0 }
   0xb   : > { %p3820_p8 = por %p204_p5, %p203_p3  ;;  %p254_p9 = scmp.lt.s32.totalorder %s3730_s26, 3 }
   0xc   : > { %s3826_s10 = scalar_select %p185_p7, %s3718_s23, %s187_s30  }
   0xd   : > { %p255_p10 = pnand %p2540_p6, %p254_p9 }
   0xe   : > { %v327_v0 = vld [vmem:[%s4748_s2] sm:$0xff] (!%p255_p10)  ;;  %v328_v1 = vld [vmem:[%s4748_s2 + $0x8] sm:$0xff] (!%p255_p10)  ;;  %v329_v2 = vld [vmem:[%s4748_s2 + $0x10] sm:$0xff] (!%p255_p10)  ;;  %v3732_v3 = vmov (!%p255_p10), 0.0|0.0   ;;  %vm3733_vm0 = vmmov (!%p255_p10), 0   ;;  %v3734_v10 = vmov (!%p255_p10), 0.0  }
   0xf   : > { %258 = sbr.rel (%p255_p10) target bundleno = 1387 (0x56b), region = 44  ;;  %3272 = vmatprep.subr.bf16.mxu0 (!%p255_p10), %v3732_v3  ;;  %v3273_v4 = vpack.c.bf16 (!%p255_p10), %v328_v1, %v327_v0  ;;  %3296 = vmatprep.subr.bf16.mxu1 (!%p255_p10), %v3732_v3  ;;  %v330_v5 = vld [vmem:[%s4748_s2 + $0x18] sm:$0xff] (!%p255_p10)  ;;  %v343_v6 = vld [vmem:[%s4748_s2 + $0x80] sm:$0xff] (!%p255_p10)  ;;  %v344_v7 = vld [vmem:[%s4748_s2 + $0x88] sm:$0xff] (!%p255_p10)  ;;  %p293_p11 = scmp.lt.s32.totalorder (!%p255_p10), %s3722_s24, 1  ;;  %vm320_vm1 = vcmask (!%p255_p10), 64512  }
  0x10   : > { %v3297_v8 = vpack.c.bf16 (!%p255_p10), %v344_v7, %v343_v6  ;;  %v345_v9 = vld [vmem:[%s4748_s2 + $0x90] sm:$0xff] (!%p255_p10)  ;;  %2824 = vmatprep.mubr.msk.f32.mxu0 (!%p255_p10), %vm3733_vm0, %v3734_v10  ;;  %2859 = vmatprep.mubr.msk.f32.mxu1 (!%p255_p10), %vm3733_vm0, %v3734_v10  ;;  %v3276_v11 = vpack.c.bf16 (!%p255_p10), %v330_v5, %v329_v2  ;;  %v346_v12 = vld [vmem:[%s4748_s2 + $0x98] sm:$0xff] (!%p255_p10)  ;;  %v331_v13 = vld [vmem:[%s4748_s2 + $0x20] sm:$0xff] (!%p255_p10)  ;;  %321 = vst.msk [vmem:[#allocation4] sm:$0xff] (!%p255_p10), %vm320_vm1, %v3734_v10  ;;  %vm311_vm2 = vcmask (!%p255_p10), 7168   ;;  %s290_s14 = sand.u32 (!%p255_p10), 1, %s3714_s22  }
  0x11   : > { %3274 = vmatpush3.bf16.msra.mxu0 (!%p255_p10), %v3273_v4  ;;  %v332_v14 = vld [vmem:[%s4748_s2 + $0x28] sm:$0xff] (!%p255_p10)  ;;  %v3300_v15 = vpack.c.bf16 (!%p255_p10), %v346_v12, %v345_v9  ;;  %v347_v16 = vld [vmem:[%s4748_s2 + $0xa0] sm:$0xff] (!%p255_p10)  ;;  %v333_v19 = vld [vmem:[%s4748_s2 + $0x30] sm:$0xff] (!%p255_p10)  ;;  %322 = vst.msk [vmem:[#allocation4 + $0x8] sm:$0xff] (!%p255_p10), %vm320_vm1, %v3734_v10  ;;  %s2561_s17 = sshll.u32 (!%p255_p10), %s3722_s24, 7  ;;  %s2433_s27 = scalar_lea.sflag (!%p255_p10), [#allocation6], %s290_s14 }
  0x12   : > { %3275 = vmatprep.subr.bf16.mxu0 (!%p255_p10), %v3732_v3  ;;  %3298 = vmatpush3.bf16.msra.mxu1 (!%p255_p10), %v3297_v8  ;;  %v348_v17 = vld [vmem:[%s4748_s2 + $0xa8] sm:$0xff] (!%p255_p10)  ;;  %v3279_v18 = vpack.c.bf16 (!%p255_p10), %v332_v14, %v331_v13  ;;  %v334_v20 = vld [vmem:[%s4748_s2 + $0x38] sm:$0xff] (!%p255_p10)  ;;  %v349_v22 = vld [vmem:[%s4748_s2 + $0xb0] sm:$0xff] (!%p255_p10)  ;;  %323 = vst.msk [vmem:[#allocation4 + $0x10] sm:$0xff] (!%p255_p10), %vm320_vm1, %v3734_v10  ;;  %s4701_s20 = scalar_lea.hbm (!%p255_p10), %s4752_s6, %s2561_s17 }
  0x13   : > { %3299 = vmatprep.subr.bf16.mxu1 (!%p255_p10), %v3732_v3  ;;  %v3303_v21 = vpack.c.bf16 (!%p255_p10), %v348_v17, %v347_v16  ;;  %v350_v23 = vld [vmem:[%s4748_s2 + $0xb8] sm:$0xff] (!%p255_p10)  ;;  %v3282_v24 = vpack.c.bf16 (!%p255_p10), %v334_v20, %v333_v19  ;;  %v335_v25 = vld [vmem:[%s4748_s2 + $0x40] sm:$0xff] (!%p255_p10)  ;;  %v336_v26 = vld [vmem:[%s4748_s2 + $0x48] sm:$0xff] (!%p255_p10)  ;;  %324 = vst.msk [vmem:[#allocation4 + $0x18] sm:$0xff] (!%p255_p10), %vm320_vm1, %v3734_v10 }
  0x14   : > { %v3306_v27 = vpack.c.bf16 (!%p255_p10), %v350_v23, %v349_v22  ;;  %v351_v28 = vld [vmem:[%s4748_s2 + $0xc0] sm:$0xff] (!%p255_p10)  ;;  %v352_v29 = vld [vmem:[%s4748_s2 + $0xc8] sm:$0xff] (!%p255_p10)  ;;  %v3285_v30 = vpack.c.bf16 (!%p255_p10), %v336_v26, %v335_v25  ;;  %v337_v31 = vld [vmem:[%s4748_s2 + $0x50] sm:$0xff] (!%p255_p10)  ;;  %316 = vst.msk [vmem:[#allocation3] sm:$0xff] (!%p255_p10), %vm311_vm2, %v3734_v10 }
  0x15   : > { %3277 = vmatpush3.bf16.msra.mxu0 (!%p255_p10), %v3276_v11  ;;  %v338_v32 = vld [vmem:[%s4748_s2 + $0x58] sm:$0xff] (!%p255_p10)  ;;  %v3309_v33 = vpack.c.bf16 (!%p255_p10), %v352_v29, %v351_v28  ;;  %v353_v34 = vld [vmem:[%s4748_s2 + $0xd0] sm:$0xff] (!%p255_p10)  ;;  %v339_v37 = vld [vmem:[%s4748_s2 + $0x60] sm:$0xff] (!%p255_p10)  ;;  %317 = vst.msk [vmem:[#allocation3 + $0x8] sm:$0xff] (!%p255_p10), %vm311_vm2, %v3734_v10 }
  0x16   : > { %3278 = vmatprep.subr.bf16.mxu0 %v3732_v3  ;;  %3301 = vmatpush3.bf16.msra.mxu1 %v3300_v15  ;;  %v354_v35 = vld [vmem:[%s4748_s2 + $0xd8] sm:$0xff]  ;;  %v3288_v36 = vpack.c.bf16 %v338_v32, %v337_v31  ;;  %v340_v38 = vld [vmem:[%s4748_s2 + $0x68] sm:$0xff]  ;;  %v355_v40 = vld [vmem:[%s4748_s2 + $0xe0] sm:$0xff]  ;;  %s3930_s11 = scalar_select %p293_p11, %s3722_s24, 1  ;;  %318 = vst.msk [vmem:[#allocation3 + $0x10] sm:$0xff] %vm311_vm2, %v3734_v10 }
  0x17   : > { %3302 = vmatprep.subr.bf16.mxu1 %v3732_v3  ;;  %v3312_v39 = vpack.c.bf16 %v354_v35, %v353_v34  ;;  %v356_v41 = vld [vmem:[%s4748_s2 + $0xe8] sm:$0xff]  ;;  %v3291_v42 = vpack.c.bf16 %v340_v38, %v339_v37  ;;  %v341_v43 = vld [vmem:[%s4748_s2 + $0x70] sm:$0xff]  ;;  %v342_v44 = vld [vmem:[%s4748_s2 + $0x78] sm:$0xff]  ;;  %319 = vst.msk [vmem:[#allocation3 + $0x18] sm:$0xff] %vm311_vm2, %v3734_v10  ;;  %s3737_s24 = smov [#allocation5]  }
  0x18   : > { %v3315_v45 = vpack.c.bf16 %v356_v41, %v355_v40  ;;  %s2542_s16 = sshll.u32 %s3930_s11, 3  ;;  %v357_v46 = vld [vmem:[%s4748_s2 + $0xf0] sm:$0xff]  ;;  %v358_v47 = vld [vmem:[%s4748_s2 + $0xf8] sm:$0xff]  ;;  %v3294_v48 = vpack.c.bf16 %v342_v44, %v341_v43  ;;  %v359_v50 = vld [vmem:[%s4748_s2 + $0x100] sm:$0xff]  ;;  %s2541_s11 = sshll.u32 %s290_s14, 3 }
  0x19   : > { %3280 = vmatpush3.bf16.msra.mxu0 %v3279_v18  ;;  %s299_s30 = scalar_lea.vmem %s4746_s0, %s2542_s16  ;;  %v3318_v49 = vpack.c.bf16 %v358_v47, %v357_v46  ;;  %v360_v51 = vld [vmem:[%s4748_s2 + $0x108] sm:$0xff]  ;;  %v375_v52 = vld [vmem:[%s4748_s2 + $0x180] sm:$0xff]  ;;  %v361_v56 = vld [vmem:[%s4748_s2 + $0x110] sm:$0xff]  ;;  %s306_s28 = scalar_lea.vmem %s4747_s1, %s2542_s16 }
  0x1a   : > { %3281 = vmatprep.subr.bf16.mxu0 %v3732_v3  ;;  %3304 = vmatpush3.bf16.msra.mxu1 %v3303_v21  ;;  %v376_v53 = vld [vmem:[%s4748_s2 + $0x188] sm:$0xff]  ;;  %v3966_v54 = vld [vmem:[%s299_s30] sm:$0xff]  ;;  %v3321_v55 = vpack.c.bf16 %v360_v51, %v359_v50  ;;  %v362_v57 = vld [vmem:[%s4748_s2 + $0x118] sm:$0xff]  ;;  %s292_s15 = scalar_lea.vmem [#allocation5], %s2541_s11 }
  0x1b   : > { %3305 = vmatprep.subr.bf16.mxu1 %v3732_v3  ;;  %v3345_v58 = vpack.c.bf16 %v376_v53, %v375_v52  ;;  %v377_v59 = vld [vmem:[%s4748_s2 + $0x190] sm:$0xff]  ;;  %v378_v60 = vld [vmem:[%s4748_s2 + $0x198] sm:$0xff]  ;;  %v3324_v61 = vpack.c.bf16 %v362_v57, %v361_v56  ;;  %v363_v62 = vld [vmem:[%s4748_s2 + $0x120] sm:$0xff]  ;;  %s2447_s16 = sshll.u32 %s292_s15, 4  ;;  %s4696_s16 = int_to_ptr.vmem [resolvable:$true] %s2447_s16 }
  0x1c   : > { %v364_v63 = vld [vmem:[%s4748_s2 + $0x128] sm:$0xff]  ;;  %v3348_v0 = vpack.c.bf16 %v378_v60, %v377_v59  ;;  %v379_v1 = vld [vmem:[%s4748_s2 + $0x1a0] sm:$0xff]  ;;  %v365_v5 = vld [vmem:[%s4748_s2 + $0x130] sm:$0xff]  ;;  %s3652_s8 = scalar_lea.vmem %s4696_s16, 128 }
  0x1d   : > { %3283 = vmatpush3.bf16.msra.mxu0 %v3282_v24  ;;  %v380_v2 = vld [vmem:[%s4748_s2 + $0x1a8] sm:$0xff]  ;;  %v3327_v4 = vpack.c.bf16 %v364_v63, %v363_v62  ;;  %v366_v6 = vld [vmem:[%s4748_s2 + $0x138] sm:$0xff]  ;;  %v381_v8 = vld [vmem:[%s4748_s2 + $0x1b0] sm:$0xff]  ;;  %p3653_p12 = scmp.ne.s32.totalorder %s4696_s16, %s3652_s8 }
  0x1e   : > { %3284 = vmatprep.subr.bf16.mxu0 %v3732_v3  ;;  %3307 = vmatpush3.bf16.msra.mxu1 %v3306_v27  ;;  %v3351_v7 = vpack.c.bf16 %v380_v2, %v379_v1  ;;  %v382_v9 = vld [vmem:[%s4748_s2 + $0x1b8] sm:$0xff]  ;;  %v3330_v11 = vpack.c.bf16 %v366_v6, %v365_v5  ;;  %v367_v12 = vld [vmem:[%s4748_s2 + $0x140] sm:$0xff]  ;;  %v368_v13 = vld [vmem:[%s4748_s2 + $0x148] sm:$0xff] }
  0x1f   : > { %3308 = vmatprep.subr.bf16.mxu1 %v3732_v3  ;;  %v3354_v14 = vpack.c.bf16 %v382_v9, %v381_v8  ;;  %v383_v15 = vld [vmem:[%s4748_s2 + $0x1c0] sm:$0xff]  ;;  %v384_v16 = vld [vmem:[%s4748_s2 + $0x1c8] sm:$0xff]  ;;  %v3333_v17 = vpack.c.bf16 %v368_v13, %v367_v12  ;;  %v369_v18 = vld [vmem:[%s4748_s2 + $0x150] sm:$0xff]  ;;  %p3654_p13 = pnand %p3653_p12, %p3813_p4 }
  0x20   : > { %v370_v19 = vld [vmem:[%s4748_s2 + $0x158] sm:$0xff]  ;;  %v3357_v20 = vpack.c.bf16 %v384_v16, %v383_v15  ;;  %v385_v21 = vld [vmem:[%s4748_s2 + $0x1d0] sm:$0xff]  ;;  %v371_v24 = vld [vmem:[%s4748_s2 + $0x160] sm:$0xff] }
  0x21   : > { %3286 = vmatpush3.bf16.msra.mxu0 %v3285_v30  ;;  %v386_v22 = vld [vmem:[%s4748_s2 + $0x1d8] sm:$0xff]  ;;  %v3336_v23 = vpack.c.bf16 %v370_v19, %v369_v18  ;;  %v372_v25 = vld [vmem:[%s4748_s2 + $0x168] sm:$0xff]  ;;  %v387_v27 = vld [vmem:[%s4748_s2 + $0x1e0] sm:$0xff]  ;;  %p3655_p0 = pneg %p3654_p13 }
  0x22   : > { %3287 = vmatprep.subr.bf16.mxu0 %v3732_v3  ;;  %3310 = vmatpush3.bf16.msra.mxu1 %v3309_v33  ;;  %v3360_v26 = vpack.c.bf16 %v386_v22, %v385_v21  ;;  %v388_v28 = vld [vmem:[%s4748_s2 + $0x1e8] sm:$0xff]  ;;  %v3339_v29 = vpack.c.bf16 %v372_v25, %v371_v24  ;;  %v373_v30 = vld [vmem:[%s4748_s2 + $0x170] sm:$0xff]  ;;  %v374_v31 = vld [vmem:[%s4748_s2 + $0x178] sm:$0xff] }
  0x23   : > { %3311 = vmatprep.subr.bf16.mxu1 %v3732_v3  ;;  %v3363_v32 = vpack.c.bf16 %v388_v28, %v387_v27  ;;  %v389_v33 = vld [vmem:[%s4748_s2 + $0x1f0] sm:$0xff]  ;;  %v390_v34 = vld [vmem:[%s4748_s2 + $0x1f8] sm:$0xff]  ;;  %v3342_v35 = vpack.c.bf16 %v374_v31, %v373_v30  ;;  %v671_v37 = vld [vmem:[%s4749_s3] sm:$0xff] }
  0x24   : > { %v672_v38 = vld [vmem:[%s4749_s3 + $0x8] sm:$0xff]  ;;  %v674_v43 = vld [vmem:[%s4749_s3 + $0x18] sm:$0xff]  ;;  %v691_v51 = vld [vmem:[%s4749_s3 + $0xa0] sm:$0xff] }
  0x25   : > { %3289 = vmatpush3.bf16.msra.mxu0 %v3288_v36  ;;  %v3366_v36 = vpack.c.bf16 %v390_v34, %v389_v33  ;;  %v688_v40 = vld [vmem:[%s4749_s3 + $0x88] sm:$0xff]  ;;  %v3369_v41 = vpack.c.bf16 %v672_v38, %v671_v37  ;;  %v690_v46 = vld [vmem:[%s4749_s3 + $0x98] sm:$0xff]  ;;  %v693_v57 = vld [vmem:[%s4749_s3 + $0xb0] sm:$0xff] }
  0x26   : > { %3290 = vmatprep.subr.bf16.mxu0 %v3732_v3  ;;  %3313 = vmatpush3.bf16.msra.mxu1 %v3312_v39  ;;  %v687_v39 = vld [vmem:[%s4749_s3 + $0x80] sm:$0xff]  ;;  %v692_v52 = vld [vmem:[%s4749_s3 + $0xa8] sm:$0xff]  ;;  %v681_v2 = vld [vmem:[%s4749_s3 + $0x50] sm:$0xff] }
  0x27   : > { %3314 = vmatprep.subr.bf16.mxu1 %v3732_v3  ;;  %v3393_v44 = vpack.c.bf16 %v688_v40, %v687_v39  ;;  %v3399_v56 = vpack.c.bf16 %v692_v52, %v691_v51  ;;  %v679_v60 = vld [vmem:[%s4749_s3 + $0x40] sm:$0xff]  ;;  %v697_v6 = vld [vmem:[%s4749_s3 + $0xd0] sm:$0xff]  ;;  %v704_v24 = vld [vmem:[%s4749_s3 + $0x108] sm:$0xff] }
  0x28   : > { %v695_v63 = vld [vmem:[%s4749_s3 + $0xc0] sm:$0xff]  ;;  %v685_v16 = vld [vmem:[%s4749_s3 + $0x70] sm:$0xff]  ;;  %v706_v30 = vld [vmem:[%s4749_s3 + $0x118] sm:$0xff] }
  0x29   : > { %3292 = vmatpush3.bf16.msra.mxu0 %v3291_v42  ;;  %v673_v42 = vld [vmem:[%s4749_s3 + $0x10] sm:$0xff]  ;;  %v683_v9 = vld [vmem:[%s4749_s3 + $0x60] sm:$0xff]  ;;  %v722_v33 = vld [vmem:[%s4749_s3 + $0x198] sm:$0xff] }
  0x2a   : > { %3293 = vmatprep.subr.bf16.mxu0 %v3732_v3  ;;  %3316 = vmatpush3.bf16.msra.mxu1 %v3315_v45  ;;  %v689_v45 = vld [vmem:[%s4749_s3 + $0x90] sm:$0xff]  ;;  %v3372_v47 = vpack.c.bf16 %v674_v43, %v673_v42  ;;  %v699_v13 = vld [vmem:[%s4749_s3 + $0xe0] sm:$0xff]  ;;  %v724_v39 = vld [vmem:[%s4749_s3 + $0x1a8] sm:$0xff] }
  0x2b   : > { %3317 = vmatprep.subr.bf16.mxu1 %v3732_v3  ;;  %v3396_v50 = vpack.c.bf16 %v690_v46, %v689_v45  ;;  %v701_v19 = vld [vmem:[%s4749_s3 + $0xf0] sm:$0xff]  ;;  %v719_v25 = vld [vmem:[%s4749_s3 + $0x180] sm:$0xff]  ;;  %v710_v42 = vld [vmem:[%s4749_s3 + $0x138] sm:$0xff] }
  0x2c   : > { %v4209_v27 = vld [vmem:[%s306_s28] sm:$0xff]  ;;  %v726_v45 = vld [vmem:[%s4749_s3 + $0x1b8] sm:$0xff]  ;;  %v728_v51 = vld [vmem:[%s4749_s3 + $0x1c8] sm:$0xff]  ;;  %s3656_s28 = sshll.u32 %s3737_s24, 4  ;;  %s3657_s28 = int_to_ptr.vmem [resolvable:$false] %s3656_s28 }
  0x2d   : > { %3295 = vmatpush3.bf16.msra.mxu0 %v3294_v48  ;;  %v675_v48 = vld [vmem:[%s4749_s3 + $0x20] sm:$0xff]  ;;  %s3658_s12 = scalar_lea.vmem %s3657_s28, 256  ;;  %p3659_p1 = scmp.lt.s32.totalorder %s4696_s16, %s3657_s28 }
  0x2e   : > { %3320 = vmatprep.subr.bf16.mxu0 %v3732_v3  ;;  %3319 = vmatpush3.bf16.msra.mxu1 %v3318_v49  ;;  %v676_v49 = vld [vmem:[%s4749_s3 + $0x28] sm:$0xff]  ;;  %v723_v38 = vld [vmem:[%s4749_s3 + $0x1a0] sm:$0xff]  ;;  %p3660_p2 = scmp.lt.s32.totalorder %s3658_s12, %s3652_s8 }
  0x2f   : > { %3344 = vmatprep.subr.bf16.mxu1 %v3732_v3  ;;  %v3375_v53 = vpack.c.bf16 %v676_v49, %v675_v48  ;;  %v3447_v43 = vpack.c.bf16 %v724_v39, %v723_v38  ;;  %v712_v48 = vld [vmem:[%s4749_s3 + $0x148] sm:$0xff]  ;;  %v1065_v38 = vld [vmem:[%s4750_s4 + $0x190] sm:$0xff]  ;;  %v1066_v39 = vld [vmem:[%s4750_s4 + $0x198] sm:$0xff] }
  0x30   : > { %2825 = vmatmul.mubr.f32.vlgmr.msra.gmra.mrb[0].mxu0 %v3966_v54  ;;  %p3661_p3 = por %p3660_p2, %p3659_p1 }
  0x31   : > { %3322 = vmatpush3.bf16.msra.mxu0 %v3321_v55  ;;  %2860 = vmatmul.mubr.f32.vlgmr.msra.gmra.mrb[0].mxu1 %v3966_v54  ;;  %v678_v55 = vld [vmem:[%s4749_s3 + $0x38] sm:$0xff] }
  0x32   : > { %3323 = vmatprep.subr.bf16.mxu0 %v3732_v3  ;;  %3346 = vmatpush3.bf16.msra.mxu1 %v3345_v58  ;;  %v694_v58 = vld [vmem:[%s4749_s3 + $0xb8] sm:$0xff]  ;;  %p3662_p5 = pnand %p3661_p3, %p3655_p0 }
  0x33   : > { %3347 = vmatprep.subr.bf16.mxu1 %v3732_v3  ;;  %2894 = vmatprep.mubr.msk.f32.mxu0 %vm3733_vm0, %v3734_v10  ;;  %v3402_v62 = vpack.c.bf16 %v694_v58, %v693_v57  ;;  %v730_v57 = vld [vmem:[%s4749_s3 + $0x1d8] sm:$0xff] }
  0x34   : > { %2929 = vmatprep.mubr.msk.f32.mxu1 %vm3733_vm0, %v3734_v10 }
  0x35   : > { %3325 = vmatpush3.bf16.msra.mxu0 %v3324_v61  ;;  %v680_v61 = vld [vmem:[%s4749_s3 + $0x48] sm:$0xff] }
  0x36   : > { %3326 = vmatprep.subr.bf16.mxu0 %v3732_v3  ;;  %3349 = vmatpush3.bf16.msra.mxu1 %v3348_v0  ;;  %v696_v0 = vld [vmem:[%s4749_s3 + $0xc8] sm:$0xff]  ;;  %v3381_v1 = vpack.c.bf16 %v680_v61, %v679_v60 }
  0x37   : > { %3350 = vmatprep.subr.bf16.mxu1 %v3732_v3  ;;  %v3405_v5 = vpack.c.bf16 %v696_v0, %v695_v63  ;;  %v716_v60 = vld [vmem:[%s4749_s3 + $0x168] sm:$0xff] }
  0x38   : > { %v732_v63 = vld [vmem:[%s4749_s3 + $0x1e8] sm:$0xff] }
  0x39   : > { %3328 = vmatpush3.bf16.msra.mxu0 %v3327_v4  ;;  %v682_v4 = vld [vmem:[%s4749_s3 + $0x58] sm:$0xff] }
  0x3a   : > { %3329 = vmatprep.subr.bf16.mxu0 %v3732_v3  ;;  %3352 = vmatpush3.bf16.msra.mxu1 %v3351_v7  ;;  %v698_v7 = vld [vmem:[%s4749_s3 + $0xd8] sm:$0xff]  ;;  %v3384_v8 = vpack.c.bf16 %v682_v4, %v681_v2 }
  0x3b   : > { %3353 = vmatprep.subr.bf16.mxu1 %v3732_v3  ;;  %v3408_v12 = vpack.c.bf16 %v698_v7, %v697_v6  ;;  %v718_v2 = vld [vmem:[%s4749_s3 + $0x178] sm:$0xff] }
  0x3c   : > { %v734_v6 = vld [vmem:[%s4749_s3 + $0x1f8] sm:$0xff] }
  0x3d   : > { %3331 = vmatpush3.bf16.msra.mxu0 %v3330_v11  ;;  %v684_v11 = vld [vmem:[%s4749_s3 + $0x68] sm:$0xff] }
  0x3e   : > { %3332 = vmatprep.subr.bf16.mxu0 %v3732_v3  ;;  %3355 = vmatpush3.bf16.msra.mxu1 %v3354_v14  ;;  %v700_v14 = vld [vmem:[%s4749_s3 + $0xe8] sm:$0xff]  ;;  %v3387_v15 = vpack.c.bf16 %v684_v11, %v683_v9  ;;  %v1031_v9 = vld [vmem:[%s4750_s4 + $0x80] sm:$0xff] }
  0x3f   : > { %3356 = vmatprep.subr.bf16.mxu1 %v3732_v3  ;;  %v3411_v18 = vpack.c.bf16 %v700_v14, %v699_v13  ;;  %v1032_v11 = vld [vmem:[%s4750_s4 + $0x88] sm:$0xff]  ;;  %v1033_v13 = vld [vmem:[%s4750_s4 + $0x90] sm:$0xff]  ;;  %v1034_v14 = vld [vmem:[%s4750_s4 + $0x98] sm:$0xff] }
  0x41   : > { %3334 = vmatpush3.bf16.msra.mxu0 %v3333_v17  ;;  %v686_v17 = vld [vmem:[%s4749_s3 + $0x78] sm:$0xff] }
  0x42   : > { %3335 = vmatprep.subr.bf16.mxu0 %v3732_v3  ;;  %3358 = vmatpush3.bf16.msra.mxu1 %v3357_v20  ;;  %v702_v20 = vld [vmem:[%s4749_s3 + $0xf8] sm:$0xff]  ;;  %v3390_v21 = vpack.c.bf16 %v686_v17, %v685_v16  ;;  %v1035_v16 = vld [vmem:[%s4750_s4 + $0xa0] sm:$0xff]  ;;  %v1036_v17 = vld [vmem:[%s4750_s4 + $0xa8] sm:$0xff] }
  0x43   : > { %3359 = vmatprep.subr.bf16.mxu1 %v3732_v3  ;;  %v3414_v22 = vpack.c.bf16 %v702_v20, %v701_v19  ;;  %v1037_v19 = vld [vmem:[%s4750_s4 + $0xb0] sm:$0xff]  ;;  %v1038_v20 = vld [vmem:[%s4750_s4 + $0xb8] sm:$0xff] }
  0x45   : > { %3337 = vmatpush3.bf16.msra.mxu0 %v3336_v23  ;;  %v703_v23 = vld [vmem:[%s4749_s3 + $0x100] sm:$0xff] }
  0x46   : > { %3338 = vmatprep.subr.bf16.mxu0 %v3732_v3  ;;  %3361 = vmatpush3.bf16.msra.mxu1 %v3360_v26  ;;  %v720_v26 = vld [vmem:[%s4749_s3 + $0x188] sm:$0xff]  ;;  %v3417_v28 = vpack.c.bf16 %v704_v24, %v703_v23 }
  0x47   : > { %3362 = vmatprep.subr.bf16.mxu1 %v3732_v3  ;;  %v3441_v31 = vpack.c.bf16 %v720_v26, %v719_v25  ;;  %v1040_v23 = vld [vmem:[%s4750_s4 + $0xc8] sm:$0xff]  ;;  %v1041_v25 = vld [vmem:[%s4750_s4 + $0xd0] sm:$0xff]  ;;  %v1042_v26 = vld [vmem:[%s4750_s4 + $0xd8] sm:$0xff] }
  0x49   : > { %3340 = vmatpush3.bf16.msra.mxu0 %v3339_v29  ;;  %v705_v29 = vld [vmem:[%s4749_s3 + $0x110] sm:$0xff] }
  0x4a   : > { %3341 = vmatprep.subr.bf16.mxu0 %v3732_v3  ;;  %3364 = vmatpush3.bf16.msra.mxu1 %v3363_v32  ;;  %v721_v32 = vld [vmem:[%s4749_s3 + $0x190] sm:$0xff]  ;;  %v3420_v34 = vpack.c.bf16 %v706_v30, %v705_v29  ;;  %v1043_v29 = vld [vmem:[%s4750_s4 + $0xe0] sm:$0xff]  ;;  %v1044_v30 = vld [vmem:[%s4750_s4 + $0xe8] sm:$0xff] }
  0x4b   : > { %3365 = vmatprep.subr.bf16.mxu1 %v3732_v3  ;;  %v3444_v37 = vpack.c.bf16 %v722_v33, %v721_v32  ;;  %v1045_v32 = vld [vmem:[%s4750_s4 + $0xf0] sm:$0xff]  ;;  %v1046_v33 = vld [vmem:[%s4750_s4 + $0xf8] sm:$0xff] }
  0x4d   : > { %3343 = vmatpush3.bf16.msra.mxu0 %v3342_v35  ;;  %v707_v35 = vld [vmem:[%s4749_s3 + $0x120] sm:$0xff] }
  0x4e   : > { %3368 = vmatprep.subr.bf16.mxu0 %v3732_v3  ;;  %3367 = vmatpush3.bf16.msra.mxu1 %v3366_v36  ;;  %v708_v36 = vld [vmem:[%s4749_s3 + $0x128] sm:$0xff] }
  0x4f   : > { %3392 = vmatprep.subr.bf16.mxu1 %v3732_v3  ;;  %v3423_v40 = vpack.c.bf16 %v708_v36, %v707_v35  ;;  %v1063_v35 = vld [vmem:[%s4750_s4 + $0x180] sm:$0xff]  ;;  %v1064_v36 = vld [vmem:[%s4750_s4 + $0x188] sm:$0xff] }
  0x50   : > { %2895 = vmatmul.mubr.f32.vlgmr.msra.gmra.mrb[2].mxu0 %v3966_v54 }
  0x51   : > { %3370 = vmatpush3.bf16.msra.mxu0 %v3369_v41  ;;  %2930 = vmatmul.mubr.f32.vlgmr.msra.gmra.mrb[2].mxu1 %v3966_v54  ;;  %v677_v54 = vld [vmem:[%s4749_s3 + $0x30] sm:$0xff] }
  0x52   : > { %3371 = vmatprep.subr.bf16.mxu0 %v3732_v3  ;;  %3394 = vmatpush3.bf16.msra.mxu1 %v3393_v44  ;;  %v3378_v59 = vpack.c.bf16 %v678_v55, %v677_v54  ;;  %v709_v41 = vld [vmem:[%s4749_s3 + $0x130] sm:$0xff]  ;;  %v714_v54 = vld [vmem:[%s4749_s3 + $0x158] sm:$0xff] }
  0x53   : > { %3395 = vmatprep.subr.bf16.mxu1 %v3732_v3  ;;  %2964 = vmatprep.mubr.msk.f32.mxu0 %vm3733_vm0, %v3734_v10  ;;  %v725_v44 = vld [vmem:[%s4749_s3 + $0x1b0] sm:$0xff]  ;;  %v3426_v46 = vpack.c.bf16 %v710_v42, %v709_v41  ;;  %v1067_v41 = vld [vmem:[%s4750_s4 + $0x1a0] sm:$0xff]  ;;  %v1068_v42 = vld [vmem:[%s4750_s4 + $0x1a8] sm:$0xff] }
  0x54   : > { %2999 = vmatprep.mubr.msk.f32.mxu1 %vm3733_vm0, %v3734_v10  ;;  %v3450_v49 = vpack.c.bf16 %v726_v45, %v725_v44  ;;  %v1069_v44 = vld [vmem:[%s4750_s4 + $0x1b0] sm:$0xff]  ;;  %v1070_v45 = vld [vmem:[%s4750_s4 + $0x1b8] sm:$0xff] }
  0x55   : > { %3373 = vmatpush3.bf16.msra.mxu0 %v3372_v47  ;;  %v711_v47 = vld [vmem:[%s4749_s3 + $0x140] sm:$0xff] }
  0x56   : > { %3374 = vmatprep.subr.bf16.mxu0 %v3732_v3  ;;  %3397 = vmatpush3.bf16.msra.mxu1 %v3396_v50  ;;  %v727_v50 = vld [vmem:[%s4749_s3 + $0x1c0] sm:$0xff]  ;;  %v3429_v52 = vpack.c.bf16 %v712_v48, %v711_v47  ;;  %v1072_v48 = vld [vmem:[%s4750_s4 + $0x1c8] sm:$0xff] }
  0x57   : > { %3398 = vmatprep.subr.bf16.mxu1 %v3732_v3  ;;  %v3453_v55 = vpack.c.bf16 %v728_v51, %v727_v50  ;;  %v1071_v47 = vld [vmem:[%s4750_s4 + $0x1c0] sm:$0xff]  ;;  %v1073_v50 = vld [vmem:[%s4750_s4 + $0x1d0] sm:$0xff]  ;;  %v1074_v51 = vld [vmem:[%s4750_s4 + $0x1d8] sm:$0xff] }
  0x59   : > { %3376 = vmatpush3.bf16.msra.mxu0 %v3375_v53  ;;  %v713_v53 = vld [vmem:[%s4749_s3 + $0x150] sm:$0xff] }
  0x5a   : > { %3377 = vmatprep.subr.bf16.mxu0 %v3732_v3  ;;  %3400 = vmatpush3.bf16.msra.mxu1 %v3399_v56  ;;  %v729_v56 = vld [vmem:[%s4749_s3 + $0x1d0] sm:$0xff]  ;;  %v3432_v58 = vpack.c.bf16 %v714_v54, %v713_v53  ;;  %v1075_v53 = vld [vmem:[%s4750_s4 + $0x1e0] sm:$0xff]  ;;  %v1076_v54 = vld [vmem:[%s4750_s4 + $0x1e8] sm:$0xff] }
  0x5b   : > { %3401 = vmatprep.subr.bf16.mxu1 %v3732_v3  ;;  %v3456_v61 = vpack.c.bf16 %v730_v57, %v729_v56  ;;  %v1077_v56 = vld [vmem:[%s4750_s4 + $0x1f0] sm:$0xff]  ;;  %v1078_v57 = vld [vmem:[%s4750_s4 + $0x1f8] sm:$0xff] }
  0x5d   : > { %3379 = vmatpush3.bf16.msra.mxu0 %v3378_v59  ;;  %v715_v59 = vld [vmem:[%s4749_s3 + $0x160] sm:$0xff] }
  0x5e   : > { %3380 = vmatprep.subr.bf16.mxu0 %v3732_v3  ;;  %3403 = vmatpush3.bf16.msra.mxu1 %v3402_v62  ;;  %v731_v62 = vld [vmem:[%s4749_s3 + $0x1e0] sm:$0xff]  ;;  %v3435_v0 = vpack.c.bf16 %v716_v60, %v715_v59 }
  0x5f   : > { %3404 = vmatprep.subr.bf16.mxu1 %v3732_v3  ;;  %v3459_v4 = vpack.c.bf16 %v732_v63, %v731_v62 }
  0x61   : > { %3382 = vmatpush3.bf16.msra.mxu0 %v3381_v1  ;;  %v717_v1 = vld [vmem:[%s4749_s3 + $0x170] sm:$0xff] }
  0x62   : > { %3383 = vmatprep.subr.bf16.mxu0 %v3732_v3  ;;  %3406 = vmatpush3.bf16.msra.mxu1 %v3405_v5  ;;  %v733_v5 = vld [vmem:[%s4749_s3 + $0x1f0] sm:$0xff]  ;;  %v3438_v7 = vpack.c.bf16 %v718_v2, %v717_v1 }
  0x63   : > { %3407 = vmatprep.subr.bf16.mxu1 %v3732_v3 }
  0x65   : > { %3385 = vmatpush3.bf16.msra.mxu0 %v3384_v8  ;;  %v3462_v8 = vpack.c.bf16 %v734_v6, %v733_v5 }
  0x66   : > { %3386 = vmatprep.subr.bf16.mxu0 %v3732_v3  ;;  %3409 = vmatpush3.bf16.msra.mxu1 %v3408_v12  ;;  %v3489_v12 = vpack.c.bf16 %v1032_v11, %v1031_v9 }
  0x67   : > { %3410 = vmatprep.subr.bf16.mxu1 %v3732_v3 }
  0x69   : > { %3388 = vmatpush3.bf16.msra.mxu0 %v3387_v15  ;;  %v3492_v15 = vpack.c.bf16 %v1034_v14, %v1033_v13 }
  0x6a   : > { %3389 = vmatprep.subr.bf16.mxu0 %v3732_v3  ;;  %3412 = vmatpush3.bf16.msra.mxu1 %v3411_v18  ;;  %v3495_v18 = vpack.c.bf16 %v1036_v17, %v1035_v16 }
  0x6b   : > { %3413 = vmatprep.subr.bf16.mxu1 %v3732_v3 }
  0x6d   : > { %3391 = vmatpush3.bf16.msra.mxu0 %v3390_v21  ;;  %v3498_v21 = vpack.c.bf16 %v1038_v20, %v1037_v19 }
  0x6e   : > { %3416 = vmatprep.subr.bf16.mxu0 %v3732_v3  ;;  %3415 = vmatpush3.bf16.msra.mxu1 %v3414_v22  ;;  %v1039_v22 = vld [vmem:[%s4750_s4 + $0xc0] sm:$0xff] }
  0x6f   : > { %3440 = vmatprep.subr.bf16.mxu1 %v3732_v3  ;;  %v3501_v24 = vpack.c.bf16 %v1040_v23, %v1039_v22  ;;  %v1016_v22 = vld [vmem:[%s4750_s4 + $0x8] sm:$0xff]  ;;  %v1017_v23 = vld [vmem:[%s4750_s4 + $0x10] sm:$0xff] }
  0x70   : > { %2965 = vmatmul.mubr.f32.vlgmr.msra.gmra.mrb[4].mxu0 %v4209_v27 }
  0x71   : > { %3418 = vmatpush3.bf16.msra.mxu0 %v3417_v28  ;;  %3000 = vmatmul.mubr.f32.vlgmr.msra.gmra.mrb[4].mxu1 %v4209_v27  ;;  %v3504_v28 = vpack.c.bf16 %v1042_v26, %v1041_v25  ;;  %v1018_v25 = vld [vmem:[%s4750_s4 + $0x18] sm:$0xff]  ;;  %v3735_v26 = vmov -inf  }
  0x72   : > { %3419 = vmatprep.subr.bf16.mxu0 %v3732_v3  ;;  %3442 = vmatpush3.bf16.msra.mxu1 %v3441_v31  ;;  %v3507_v31 = vpack.c.bf16 %v1044_v30, %v1043_v29  ;;  %312 = vst.msk [vmem:[#allocation2] sm:$0xff] %vm311_vm2, %v3735_v26  ;;  %313 = vst.msk [vmem:[#allocation2 + $0x8] sm:$0xff] %vm311_vm2, %v3735_v26  ;;  %v1019_v29 = vld [vmem:[%s4750_s4 + $0x20] sm:$0xff]  ;;  %v1020_v30 = vld [vmem:[%s4750_s4 + $0x28] sm:$0xff] }
  0x73   : > { %3443 = vmatprep.subr.bf16.mxu1 %v3732_v3  ;;  %3034 = vmatprep.mubr.msk.f32.mxu0 %vm3733_vm0, %v3734_v10  ;;  %314 = vst.msk [vmem:[#allocation2 + $0x10] sm:$0xff] %vm311_vm2, %v3735_v26  ;;  %315 = vst.msk [vmem:[#allocation2 + $0x18] sm:$0xff] %vm311_vm2, %v3735_v26 }
  0x74   : > { %3069 = vmatprep.mubr.msk.f32.mxu1 %vm3733_vm0, %v3734_v10 }
  0x75   : > { %3421 = vmatpush3.bf16.msra.mxu0 %v3420_v34  ;;  %v3510_v34 = vpack.c.bf16 %v1046_v33, %v1045_v32  ;;  %v1021_v32 = vld [vmem:[%s4750_s4 + $0x30] sm:$0xff]  ;;  %v1022_v33 = vld [vmem:[%s4750_s4 + $0x38] sm:$0xff] }
  0x76   : > { %3422 = vmatprep.subr.bf16.mxu0 %v3732_v3  ;;  %3445 = vmatpush3.bf16.msra.mxu1 %v3444_v37  ;;  %v3537_v37 = vpack.c.bf16 %v1064_v36, %v1063_v35  ;;  %v1023_v35 = vld [vmem:[%s4750_s4 + $0x40] sm:$0xff]  ;;  %v1024_v36 = vld [vmem:[%s4750_s4 + $0x48] sm:$0xff] }
  0x77   : > { %3446 = vmatprep.subr.bf16.mxu1 %v3732_v3 }
  0x79   : > { %3424 = vmatpush3.bf16.msra.mxu0 %v3423_v40  ;;  %v3540_v40 = vpack.c.bf16 %v1066_v39, %v1065_v38  ;;  %v1025_v38 = vld [vmem:[%s4750_s4 + $0x50] sm:$0xff]  ;;  %v1026_v39 = vld [vmem:[%s4750_s4 + $0x58] sm:$0xff] }
  0x7a   : > { %3425 = vmatprep.subr.bf16.mxu0 %v3732_v3  ;;  %3448 = vmatpush3.bf16.msra.mxu1 %v3447_v43  ;;  %v3543_v43 = vpack.c.bf16 %v1068_v42, %v1067_v41  ;;  %v1027_v41 = vld [vmem:[%s4750_s4 + $0x60] sm:$0xff]  ;;  %v1028_v42 = vld [vmem:[%s4750_s4 + $0x68] sm:$0xff] }
  0x7b   : > { %3449 = vmatprep.subr.bf16.mxu1 %v3732_v3 }
  0x7d   : > { %3427 = vmatpush3.bf16.msra.mxu0 %v3426_v46  ;;  %v3546_v46 = vpack.c.bf16 %v1070_v45, %v1069_v44  ;;  %v1029_v44 = vld [vmem:[%s4750_s4 + $0x70] sm:$0xff]  ;;  %v1030_v45 = vld [vmem:[%s4750_s4 + $0x78] sm:$0xff] }
  0x7e   : > { %3428 = vmatprep.subr.bf16.mxu0 %v3732_v3  ;;  %3451 = vmatpush3.bf16.msra.mxu1 %v3450_v49  ;;  %v3549_v49 = vpack.c.bf16 %v1072_v48, %v1071_v47  ;;  %v1047_v47 = vld [vmem:[%s4750_s4 + $0x100] sm:$0xff]  ;;  %v1048_v48 = vld [vmem:[%s4750_s4 + $0x108] sm:$0xff] }
  0x7f   : > { %3452 = vmatprep.subr.bf16.mxu1 %v3732_v3 }
  0x81   : > { %3430 = vmatpush3.bf16.msra.mxu0 %v3429_v52  ;;  %v3552_v52 = vpack.c.bf16 %v1074_v51, %v1073_v50  ;;  %v1049_v50 = vld [vmem:[%s4750_s4 + $0x110] sm:$0xff]  ;;  %v1050_v51 = vld [vmem:[%s4750_s4 + $0x118] sm:$0xff] }
  0x82   : > { %3431 = vmatprep.subr.bf16.mxu0 %v3732_v3  ;;  %3454 = vmatpush3.bf16.msra.mxu1 %v3453_v55  ;;  %v3555_v55 = vpack.c.bf16 %v1076_v54, %v1075_v53  ;;  %v1051_v53 = vld [vmem:[%s4750_s4 + $0x120] sm:$0xff]  ;;  %v1052_v54 = vld [vmem:[%s4750_s4 + $0x128] sm:$0xff] }
  0x83   : > { %3455 = vmatprep.subr.bf16.mxu1 %v3732_v3 }
  0x85   : > { %3433 = vmatpush3.bf16.msra.mxu0 %v3432_v58  ;;  %v3558_v58 = vpack.c.bf16 %v1078_v57, %v1077_v56  ;;  %v1053_v56 = vld [vmem:[%s4750_s4 + $0x130] sm:$0xff]  ;;  %v1054_v57 = vld [vmem:[%s4750_s4 + $0x138] sm:$0xff] }
  0x86   : > { %3434 = vmatprep.subr.bf16.mxu0 %v3732_v3  ;;  %3457 = vmatpush3.bf16.msra.mxu1 %v3456_v61 }
  0x87   : > { %3458 = vmatprep.subr.bf16.mxu1 %v3732_v3 }
  0x89   : > { %3436 = vmatpush3.bf16.msra.mxu0 %v3435_v0 }
  0x8a   : > { %3437 = vmatprep.subr.bf16.mxu0 %v3732_v3  ;;  %3460 = vmatpush3.bf16.msra.mxu1 %v3459_v4 }
  0x8b   : > { %3461 = vmatprep.subr.bf16.mxu1 %v3732_v3 }
  0x8d   : > { %3439 = vmatpush3.bf16.msra.mxu0 %v3438_v7 }
  0x8e   : > { %3463 = vmatpush3.bf16.msra.mxu1 %v3462_v8  ;;  %3464 = vmatprep.subr.bf16.mxu0 %v3732_v3 }
  0x8f   : > { %3488 = vmatprep.subr.bf16.mxu1 %v3732_v3 }
  0x90   : > { %3035 = vmatmul.mubr.f32.vlgmr.msra.gmra.mrb[6].mxu0 %v4209_v27 }
  0x91   : > { %3070 = vmatmul.mubr.f32.vlgmr.msra.gmra.mrb[6].mxu1 %v4209_v27  ;;  %3104 = vmatprep.mubr.msk.f32.mxu0 %vm3733_vm0, %v3734_v10 }
  0x92   : > { %3490 = vmatpush3.bf16.msra.mxu1 %v3489_v12  ;;  %3139 = vmatprep.mubr.msk.f32.mxu1 %vm3733_vm0, %v3734_v10 }
  0x93   : > { %3491 = vmatprep.subr.bf16.mxu1 %v3732_v3 }
  0x96   : > { %3493 = vmatpush3.bf16.msra.mxu1 %v3492_v15 }
  0x97   : > { %3494 = vmatprep.subr.bf16.mxu1 %v3732_v3 }
  0x9a   : > { %3496 = vmatpush3.bf16.msra.mxu1 %v3495_v18 }
  0x9b   : > { %3497 = vmatprep.subr.bf16.mxu1 %v3732_v3 }
  0x9e   : > { %3499 = vmatpush3.bf16.msra.mxu1 %v3498_v21  ;;  %v1015_v21 = vld [vmem:[%s4750_s4] sm:$0xff] }
  0x9f   : > { %3500 = vmatprep.subr.bf16.mxu1 %v3732_v3 }
  0xa2   : > { %3502 = vmatpush3.bf16.msra.mxu1 %v3501_v24  ;;  %v3465_v24 = vpack.c.bf16 %v1016_v22, %v1015_v21  ;;  %v4614_v21 = vld [vmem:[#allocation2] sm:$0xff] }
  0xa3   : > { %3503 = vmatprep.subr.bf16.mxu1 %v3732_v3 }
  0xa4   : > { %3466 = vmatpush3.bf16.msra.mxu0 %v3465_v24  ;;  %v1669_v24 = vld [vmem:[#allocation2 + $0x8] sm:$0xff] }
  0xa5   : > { %3467 = vmatprep.subr.bf16.mxu0 %v3732_v3 }
  0xa6   : > { %3505 = vmatpush3.bf16.msra.mxu1 %v3504_v28  ;;  %v3468_v28 = vpack.c.bf16 %v1018_v25, %v1017_v23 }
  0xa7   : > { %3506 = vmatprep.subr.bf16.mxu1 %v3732_v3 }
  0xa8   : > { %3469 = vmatpush3.bf16.msra.mxu0 %v3468_v28 }
  0xa9   : > { %3470 = vmatprep.subr.bf16.mxu0 %v3732_v3 }
  0xaa   : > { %3508 = vmatpush3.bf16.msra.mxu1 %v3507_v31  ;;  %v3471_v31 = vpack.c.bf16 %v1020_v30, %v1019_v29 }
  0xab   : > { %3509 = vmatprep.subr.bf16.mxu1 %v3732_v3 }
  0xac   : > { %3472 = vmatpush3.bf16.msra.mxu0 %v3471_v31 }
  0xad   : > { %3473 = vmatprep.subr.bf16.mxu0 %v3732_v3 }
  0xae   : > { %3511 = vmatpush3.bf16.msra.mxu1 %v3510_v34  ;;  %v3474_v34 = vpack.c.bf16 %v1022_v33, %v1021_v32  ;;  %v4626_v32 = vld [vmem:[#allocation2 + $0x10] sm:$0xff] }
  0xaf   : > { %3536 = vmatprep.subr.bf16.mxu1 %v3732_v3 }
  0xb0   : > { %3475 = vmatpush3.bf16.msra.mxu0 %v3474_v34 }
  0xb1   : > { %3140 = vmatmul.mubr.f32.vlgmr.msra.gmra.mrb[8].mxu1 %v4209_v27  ;;  %3476 = vmatprep.subr.bf16.mxu0 %v3732_v3 }
  0xb2   : > { %3538 = vmatpush3.bf16.msra.mxu1 %v3537_v37  ;;  %3209 = vmatprep.mubr.msk.f32.mxu1 %vm3733_vm0, %v3734_v10  ;;  %v3477_v37 = vpack.c.bf16 %v1024_v36, %v1023_v35  ;;  %v1671_v35 = vld [vmem:[#allocation2 + $0x18] sm:$0xff] }
  0xb3   : > { %3539 = vmatprep.subr.bf16.mxu1 %v3732_v3 }
  0xb4   : > { %3478 = vmatpush3.bf16.msra.mxu0 %v3477_v37 }
  0xb5   : > { %3479 = vmatprep.subr.bf16.mxu0 %v3732_v3 }
  0xb6   : > { %3541 = vmatpush3.bf16.msra.mxu1 %v3540_v40  ;;  %v3480_v40 = vpack.c.bf16 %v1026_v39, %v1025_v38 }
  0xb7   : > { %3542 = vmatprep.subr.bf16.mxu1 %v3732_v3 }
  0xb8   : > { %3481 = vmatpush3.bf16.msra.mxu0 %v3480_v40 }
  0xb9   : > { %3482 = vmatprep.subr.bf16.mxu0 %v3732_v3 }
  0xba   : > { %3544 = vmatpush3.bf16.msra.mxu1 %v3543_v43  ;;  %v3483_v43 = vpack.c.bf16 %v1028_v42, %v1027_v41 }
  0xbb   : > { %3545 = vmatprep.subr.bf16.mxu1 %v3732_v3 }
  0xbc   : > { %3484 = vmatpush3.bf16.msra.mxu0 %v3483_v43 }
  0xbd   : > { %3485 = vmatprep.subr.bf16.mxu0 %v3732_v3 }
  0xbe   : > { %3547 = vmatpush3.bf16.msra.mxu1 %v3546_v46  ;;  %v3486_v46 = vpack.c.bf16 %v1030_v45, %v1029_v44 }
  0xbf   : > { %3548 = vmatprep.subr.bf16.mxu1 %v3732_v3 }
  0xc0   : > { %3487 = vmatpush3.bf16.msra.mxu0 %v3486_v46 }
  0xc1   : > { %3512 = vmatprep.subr.bf16.mxu0 %v3732_v3 }
  0xc2   : > { %3550 = vmatpush3.bf16.msra.mxu1 %v3549_v49  ;;  %v3513_v49 = vpack.c.bf16 %v1048_v48, %v1047_v47 }
  0xc3   : > { %3551 = vmatprep.subr.bf16.mxu1 %v3732_v3  ;;  %3105 = vmatmul.mubr.f32.vlgmr.msra.gmra.mrb[8].mxu0 %v4209_v27 }
  0xc4   : > { %3514 = vmatpush3.bf16.msra.mxu0 %v3513_v49  ;;  %3174 = vmatprep.mubr.msk.f32.mxu0 %vm3733_vm0, %v3734_v10 }
  0xc5   : > { %3515 = vmatprep.subr.bf16.mxu0 %v3732_v3 }
  0xc6   : > { %3553 = vmatpush3.bf16.msra.mxu1 %v3552_v52  ;;  %v3516_v52 = vpack.c.bf16 %v1050_v51, %v1049_v50 }
  0xc7   : > { %3554 = vmatprep.subr.bf16.mxu1 %v3732_v3 }
  0xc8   : > { %3517 = vmatpush3.bf16.msra.mxu0 %v3516_v52 }
  0xc9   : > { %3518 = vmatprep.subr.bf16.mxu0 %v3732_v3 }
  0xca   : > { %3556 = vmatpush3.bf16.msra.mxu1 %v3555_v55  ;;  %v3519_v55 = vpack.c.bf16 %v1052_v54, %v1051_v53 }
  0xcb   : > { %3557 = vmatprep.subr.bf16.mxu1 %v3732_v3 }
  0xcc   : > { %3520 = vmatpush3.bf16.msra.mxu0 %v3519_v55 }
  0xcd   : > { %3521 = vmatprep.subr.bf16.mxu0 %v3732_v3 }
  0xce   : > { %3559 = vmatpush3.bf16.msra.mxu1 %v3558_v58  ;;  %v3522_v58 = vpack.c.bf16 %v1054_v57, %v1053_v56 }
  0xcf   : > { %3212 = vmatprep.subr.mxu1 %v3734_v10 }
  0xd0   : > { %3523 = vmatpush3.bf16.msra.mxu0 %v3522_v58 }
  0xd1   : > { %3210 = vmatmul.mubr.f32.vlgmr.msra.gmra.mrb[10].mxu1 %v4209_v27  ;;  %3524 = vmatprep.subr.bf16.mxu0 %v3732_v3 }
  0xd2   : > { %3214 = vmatprep.mubr.msk.f32.mxu1 %vm3733_vm0, %v3734_v10 }
 0x103   : > { %v457_v59 = vpop.f32.mrb[0].mxu0 }
 0x104   : > { %v2826_v60 = vpop.f32.mrb[1].mxu0  ;;  %v527_v61 = vpop.f32.mrb[0].mxu1  ;;  %v1359_v7 = vmul.f32 0.35355338, %v457_v59  ;;  %v1055_v59 = vld [vmem:[%s4750_s4 + $0x140] sm:$0xff] }
 0x105   : > { %v2861_v62 = vpop.f32.mrb[1].mxu1  ;;  %v1360_v9 = vmul.f32 0.35355338, %v527_v61  ;;  %v1056_v60 = vld [vmem:[%s4750_s4 + $0x148] sm:$0xff] }
 0x106   : > { %v3525_v61 = vpack.c.bf16 %v1056_v60, %v1055_v59  ;;  %v1057_v62 = vld [vmem:[%s4750_s4 + $0x150] sm:$0xff] }
 0x108   : > { %3526 = vmatpush3.bf16.msra.mxu0 %v3525_v61 }
 0x109   : > { %3527 = vmatprep.subr.bf16.mxu0 %v3732_v3 }
 0x123   : > { %v597_v63 = vpop.f32.mrb[2].mxu0 }
 0x124   : > { %v2896_v0 = vpop.f32.mrb[3].mxu0  ;;  %v667_v1 = vpop.f32.mrb[2].mxu1  ;;  %v1361_v14 = vmul.f32 0.35355338, %v597_v63  ;;  %v1058_v63 = vld [vmem:[%s4750_s4 + $0x158] sm:$0xff] }
 0x125   : > { %v2931_v2 = vpop.f32.mrb[3].mxu1  ;;  %v1362_v16 = vmul.f32 0.35355338, %v667_v1  ;;  %v3528_v0 = vpack.c.bf16 %v1058_v63, %v1057_v62  ;;  %v1059_v1 = vld [vmem:[%s4750_s4 + $0x160] sm:$0xff] }
 0x126   : > { %v1060_v2 = vld [vmem:[%s4750_s4 + $0x168] sm:$0xff] }
 0x127   : > { %3529 = vmatpush3.bf16.msra.mxu0 %v3528_v0 }
 0x128   : > { %3530 = vmatprep.subr.bf16.mxu0 %v3732_v3 }
 0x143   : > { %v801_v4 = vpop.f32.mrb[4].mxu0 }
 0x144   : > { %v2966_v5 = vpop.f32.mrb[5].mxu0  ;;  %3213 = vmatpush3.xpose.msk.msra.mxu1 %vm320_vm1, %v801_v4  ;;  %v871_v6 = vpop.f32.mrb[4].mxu1  ;;  %v3531_v4 = vpack.c.bf16 %v1060_v2, %v1059_v1 }
 0x145   : > { %3217 = vmatprep.subr.mxu1 %v3734_v10  ;;  %v3001_v8 = vpop.f32.mrb[5].mxu1  ;;  %v1061_v5 = vld [vmem:[%s4750_s4 + $0x170] sm:$0xff] }
 0x146   : > { %3532 = vmatpush3.bf16.msra.mxu0 %v3531_v4  ;;  %v1732_v4 = vld [vmem:[#allocation3] sm:$0xff] }
 0x147   : > { %3215 = vmatmul.mubr.msk.f32.vlgmr.msra.gmra.mrb[12].mxu1 %vm320_vm1, %v1359_v7  ;;  %3533 = vmatprep.subr.bf16.mxu0 %v3732_v3 }
 0x148   : > { %3218 = vmatpush3.xpose.msk.msra.mxu1 %vm320_vm1, %v871_v6  ;;  %3219 = vmatprep.mubr.msk.f32.mxu1 %vm3733_vm0, %v3734_v10  ;;  %v1062_v6 = vld [vmem:[%s4750_s4 + $0x178] sm:$0xff] }
 0x149   : > { %3222 = vmatprep.subr.mxu1 %v3734_v10  ;;  %v3534_v7 = vpack.c.bf16 %v1062_v6, %v1061_v5 }
 0x14b   : > { %3220 = vmatmul.mubr.msk.f32.vlgmr.msra.gmra.mrb[14].mxu1 %vm320_vm1, %v1360_v9  ;;  %3535 = vmatpush3.bf16.msra.mxu0 %v3534_v7  ;;  %v1733_v7 = vld [vmem:[#allocation3 + $0x8] sm:$0xff] }
 0x14c   : > { %3224 = vmatprep.mubr.msk.f32.mxu1 %vm3733_vm0, %v3734_v10  ;;  %3232 = vmatprep.subr.mxu0 %v3734_v10 }
 0x14e   : > { %3175 = vmatmul.mubr.f32.vlgmr.msra.gmra.mrb[10].mxu0 %v4209_v27 }
 0x14f   : > { %3234 = vmatprep.mubr.msk.f32.mxu0 %vm3733_vm0, %v3734_v10 }
 0x163   : > { %v941_v11 = vpop.f32.mrb[6].mxu0 }
 0x164   : > { %v3036_v12 = vpop.f32.mrb[7].mxu0  ;;  %3223 = vmatpush3.xpose.msk.msra.mxu1 %vm320_vm1, %v941_v11  ;;  %v1011_v13 = vpop.f32.mrb[6].mxu1 }
 0x165   : > { %3227 = vmatprep.subr.mxu1 %v3734_v10  ;;  %v3071_v15 = vpop.f32.mrb[7].mxu1 }
 0x166   : > { %v3736_v15 = vmov 0  }
 0x167   : > { %3225 = vmatmul.mubr.msk.f32.vlgmr.msra.gmra.mrb[16].mxu1 %vm320_vm1, %v1361_v14  ;;  %3626 = vset.pattern.permute.xlu0 %v3736_v15 }
 0x168   : > { %3228 = vmatpush3.xpose.msk.msra.mxu1 %vm320_vm1, %v1011_v13  ;;  %3229 = vmatprep.mubr.msk.f32.mxu1 %vm3733_vm0, %v3734_v10 }
 0x169   : > { %3237 = vmatprep.subr.mxu1 %v3734_v10  ;;  %3627 = vset.pattern.permute.xlu1 %v3736_v15 }
 0x16b   : > { %3230 = vmatmul.mubr.msk.f32.vlgmr.msra.gmra.mrb[18].mxu1 %vm320_vm1, %v1362_v16 }
 0x16c   : > { %3239 = vmatprep.mubr.msk.f32.mxu1 %vm3733_vm0, %v3734_v10 }
 0x184   : > { %v1215_v17 = vpop.f32.mrb[8].mxu1 }
 0x185   : > { %v3141_v18 = vpop.f32.mrb[9].mxu1  ;;  %3238 = vmatpush3.msra.mxu1 %v1215_v17 }
 0x186   : > { %3247 = vmatprep.subr.mxu1 %v3734_v10 }
 0x196   : > { %v1145_v30 = vpop.f32.mrb[8].mxu0 }
 0x197   : > { %3233 = vmatpush3.msra.mxu0 %v1145_v30  ;;  %v3106_v31 = vpop.f32.mrb[9].mxu0 }
 0x198   : > { %3242 = vmatprep.subr.mxu0 %v3734_v10 }
 0x1a4   : > { %v4472_v19 = vpop.f32.mrb[10].mxu1 }
 0x1a5   : > { %v3211_v20 = vpop.f32.mrb[11].mxu1 }
 0x21a   : > { %v1436_v8 = vpop.f32.mrb[12].mxu1 }
 0x21b   : > { %v3216_v9 = vpop.f32.mrb[13].mxu1  ;;  %v1672_v11 = vsel %vm320_vm1, %v1436_v8, -inf }
 0x21c   : > { %1673 = vmax.xlane.f32.xlu0 %v1672_v11 }
 0x21e   : > { %v1512_v12 = vpop.f32.mrb[14].mxu1 }
 0x21f   : > { %v3221_v13 = vpop.f32.mrb[15].mxu1  ;;  %v1675_v14 = vsel %vm320_vm1, %v1512_v12, -inf }
 0x220   : > { %1676 = vmax.xlane.f32.xlu0 %v1675_v14 }
 0x221   : > { %v1285_v40 = vpop.f32.mrb[10].mxu0 }
 0x222   : > { %v3176_v41 = vpop.f32.mrb[11].mxu0 }
 0x23a   : > { %v4606_v3 = vpop.f32.mrb[16].mxu1 }
 0x23b   : > { %v3226_v16 = vpop.f32.mrb[17].mxu1  ;;  %v1678_v27 = vsel %vm320_vm1, %v4606_v3, -inf }
 0x23c   : > { %1679 = vmax.xlane.f32.xlu1 %v1678_v27  ;;  %v2132_v16 = vld [vmem:[%s4751_s5] sm:$0xff] }
 0x23e   : > { %v4610_v17 = vpop.f32.mrb[18].mxu1 }
 0x23f   : > { %v3231_v18 = vpop.f32.mrb[19].mxu1  ;;  %v1681_v20 = vsel %vm320_vm1, %v4610_v17, -inf }
 0x240   : > { %1682 = vmax.xlane.f32.xlu1 %v1681_v20 }
 0x2a9   : > { %v1674_v22 = vpop.xlane.xlu0 %1673 }
 0x2aa   : > { %v4617_v23 = vmax.f32 %v4614_v21, %v1674_v22  ;;  %v1735_v22 = vld [vmem:[#allocation3 + $0x18] sm:$0xff] }
 0x2ac   : > { %v1688_v25 = vsub.f32 %v4614_v21, %v4617_v23  ;;  %2089 = vst.msk [vmem:[#allocation2] sm:$0xff] %vm311_vm2, %v4617_v23  ;;  %1702 = vperm.xlu0 %3626, %v4617_v23  }
 0x2ad   : > { %v1677_v26 = vpop.xlane.xlu0 %1676 }
 0x2ae   : > { %v1685_v28 = vmax.f32 %v1669_v24, %v1677_v26  ;;  %v1692_v1 = vmul.f32 1.442695, %v1688_v25 }
 0x2b0   : > { %v1689_v29 = vsub.f32 %v1669_v24, %v1685_v28  ;;  %2090 = vst.msk [vmem:[#allocation2 + $0x8] sm:$0xff] %vm311_vm2, %v1685_v28  ;;  %1707 = vperm.xlu1 %3627, %v1685_v28  }
 0x2b2   : > { %v1694_v52 = vmul.f32 1.442695, %v1689_v29 }
 0x2c9   : > { %v1680_v33 = vpop.xlane.xlu1 %1679 }
 0x2ca   : > { %v4629_v34 = vmax.f32 %v4626_v32, %v1680_v33 }
 0x2cc   : > { %v1690_v36 = vsub.f32 %v4626_v32, %v4629_v34  ;;  %2091 = vst.msk [vmem:[#allocation2 + $0x10] sm:$0xff] %vm311_vm2, %v4629_v34  ;;  %1712 = vperm.xlu1 %3627, %v4629_v34   ;;  %v2053_v32 = vld [vmem:[#allocation4] sm:$0xff] }
 0x2cd   : > { %v1683_v37 = vpop.xlane.xlu1 %1682 }
 0x2ce   : > { %v1687_v38 = vmax.f32 %v1671_v35, %v1683_v37  ;;  %v1696_v14 = vmul.f32 1.442695, %v1690_v36 }
 0x2d0   : > { %v1691_v39 = vsub.f32 %v1671_v35, %v1687_v38  ;;  %2092 = vst.msk [vmem:[#allocation2 + $0x18] sm:$0xff] %vm311_vm2, %v1687_v38  ;;  %1717 = vperm.xlu1 %3627, %v1687_v38   ;;  %v2054_v35 = vld [vmem:[#allocation4 + $0x8] sm:$0xff] }
 0x2d2   : > { %v1698_v53 = vmul.f32 1.442695, %v1691_v39 }
 0x32b   : > { %v1703_v42 = vpop.permute.xlu0 %1702 }
 0x32c   : > { %v1720_v43 = vsub.f32 %v1436_v8, %v1703_v42 }
 0x32e   : > { %v1724_v44 = vmul.f32 1.442695, %v1720_v43 }
 0x32f   : > { %v1708_v45 = vpop.permute.xlu1 %1707 }
 0x330   : > { %3628 = vpow2.f32 %v1724_v44  ;;  %v1721_v46 = vsub.f32 %v1512_v12, %v1708_v45  ;;  %v2056_v44 = vld [vmem:[#allocation4 + $0x18] sm:$0xff] }
 0x332   : > { %v1726_v47 = vmul.f32 1.442695, %v1721_v46 }
 0x334   : > { %3630 = vpow2.f32 %v1726_v47 }
 0x335   : > { %3632 = vpow2.f32 %v1694_v52 }
 0x336   : > { %3634 = vpow2.f32 %v1698_v53 }
 0x33a   : > { %v3629_v48 = vpop.eup %3628 }
 0x33b   : > { %3235 = vmatmul.mubr.msk.f32.vlgmr.msra.gmra.mrb[12].mxu0 %vm320_vm1, %v3629_v48  ;;  %v1740_v49 = vsel %vm320_vm1, %v3629_v48, 0.0 }
 0x33c   : > { %1741 = vadd.xlane.f32.xlu1 %v1740_v49  ;;  %3243 = vmatpush3.msra.mxu0 %v1285_v40 }
 0x33d   : > { %3244 = vmatprep.mubr.msk.f32.mxu0 %vm3733_vm0, %v3734_v10  ;;  %3252 = vmatprep.subr.mxu0 %v3734_v10 }
 0x33e   : > { %v3631_v50 = vpop.eup %3630 }
 0x33f   : > { %3240 = vmatmul.mubr.msk.f32.vlgmr.msra.gmra.mrb[20].mxu1 %vm320_vm1, %v3631_v50  ;;  %v1743_v51 = vsel %vm320_vm1, %v3631_v50, 0.0  ;;  %v3633_v60 = vpop.eup %3632 }
 0x340   : > { %3248 = vmatpush3.msra.mxu1 %v4472_v19  ;;  %1744 = vadd.xlane.f32.xlu0 %v1743_v51  ;;  %v3635_v19 = vpop.eup %3634  ;;  %v1737_v9 = vmul.f32 %v3633_v60, %v1733_v7 }
 0x341   : > { %3249 = vmatprep.mubr.msk.f32.mxu1 %vm3733_vm0, %v3734_v10  ;;  %v1739_v24 = vmul.f32 %v3635_v19, %v1735_v22 }
 0x34b   : > { %v1713_v54 = vpop.permute.xlu1 %1712 }
 0x34c   : > { %v1722_v55 = vsub.f32 %v4606_v3, %v1713_v54 }
 0x34e   : > { %v1728_v56 = vmul.f32 1.442695, %v1722_v55  ;;  %v2133_v55 = vld [vmem:[%s4751_s5 + $0x8] sm:$0xff] }
 0x34f   : > { %v1718_v57 = vpop.permute.xlu1 %1717 }
 0x350   : > { %3636 = vpow2.f32 %v1728_v56  ;;  %v1723_v58 = vsub.f32 %v4610_v17, %v1718_v57  ;;  %v1734_v17 = vld [vmem:[#allocation3 + $0x10] sm:$0xff] }
 0x351   : > { %v2055_v56 = vld [vmem:[#allocation4 + $0x10] sm:$0xff] }
 0x352   : > { %v1730_v59 = vmul.f32 1.442695, %v1723_v58 }
 0x354   : > { %3638 = vpow2.f32 %v1730_v59 }
 0x355   : > { %3640 = vpow2.f32 %v1692_v1 }
 0x356   : > { %2064 = vperm.xlu0 %3626, %v3633_v60  }
 0x35a   : > { %v3637_v61 = vpop.eup %3636  ;;  %2074 = vperm.xlu0 %3626, %v3635_v19  }
 0x35b   : > { %3245 = vmatmul.mubr.msk.f32.vlgmr.msra.gmra.mrb[14].mxu0 %vm320_vm1, %v3637_v61  ;;  %v1746_v62 = vsel %vm320_vm1, %v3637_v61, 0.0 }
 0x35c   : > { %1747 = vadd.xlane.f32.xlu1 %v1746_v62  ;;  %3254 = vmatprep.mubr.msk.f32.mxu0 %vm3733_vm0, %v3734_v10  ;;  %v2134_v62 = vld [vmem:[%s4751_s5 + $0x10] sm:$0xff] }
 0x35d   : > { %3253 = vmatpush3.msra.mxu0 %v2132_v16 }
 0x35e   : > { %v3639_v63 = vpop.eup %3638  ;;  %3257 = vmatprep.subr.mxu0 %v3734_v10 }
 0x35f   : > { %3250 = vmatmul.mubr.msk.f32.vlgmr.msra.gmra.mrb[22].mxu1 %vm320_vm1, %v3639_v63  ;;  %v1749_v0 = vsel %vm320_vm1, %v3639_v63, 0.0  ;;  %v3641_v2 = vpop.eup %3640 }
 0x360   : > { %1750 = vadd.xlane.f32.xlu1 %v1749_v0  ;;  %v1736_v5 = vmul.f32 %v3641_v2, %v1732_v4 }
 0x371   : > { %2059 = vperm.xlu1 %3627, %v3641_v2   ;;  %v2135_v2 = vld [vmem:[%s4751_s5 + $0x18] sm:$0xff] }
 0x3c9   : > { %v1742_v6 = vpop.xlane.xlu1 %1741 }
 0x3ca   : > { %v1752_v8 = vadd.f32 %v1742_v6, %v1736_v5 }
 0x3cc   : > { %1757 = vst.msk [vmem:[#allocation3] sm:$0xff] %vm311_vm2, %v1752_v8 }
 0x3cd   : > { %v1745_v11 = vpop.xlane.xlu0 %1744 }
 0x3ce   : > { %v1753_v12 = vadd.f32 %v1745_v11, %v1737_v9 }
 0x3d0   : > { %1758 = vst.msk [vmem:[#allocation3 + $0x8] sm:$0xff] %vm311_vm2, %v1753_v12 }
 0x3d3   : > { %v2096_v13 = vld [vmem:[#allocation3] sm:$0xff] }
 0x3d4   : > { %3642 = vrcp.f32 %v2096_v13 }
 0x3d5   : > { %3644 = vpow2.f32 %v1696_v14  ;;  %v2065_v36 = vpop.permute.xlu0 %2064 }
 0x3d6   : > { %v2078_v40 = vmul.f32 %v2065_v36, %v2054_v35 }
 0x3d7   : > { %v2097_v15 = vld [vmem:[#allocation3 + $0x8] sm:$0xff] }
 0x3d8   : > { %3646 = vrcp.f32 %v2097_v15 }
 0x3d9   : > { %v2075_v45 = vpop.permute.xlu0 %2074 }
 0x3da   : > { %v2080_v48 = vmul.f32 %v2075_v45, %v2056_v44 }
 0x3de   : > { %v3643_v3 = vpop.eup %3642 }
 0x3df   : > { %2110 = vperm.xlu1 %3627, %v3643_v3   ;;  %v3645_v27 = vpop.eup %3644 }
 0x3e0   : > { %v1738_v20 = vmul.f32 %v3645_v27, %v1734_v17 }
 0x3e2   : > { %v3647_v18 = vpop.eup %3646 }
 0x3e3   : > { %2069 = vperm.xlu1 %3627, %v3645_v27  }
 0x3e7   : > { %2115 = vperm.xlu1 %3627, %v3647_v18  }
 0x3e9   : > { %v1748_v21 = vpop.xlane.xlu1 %1747 }
 0x3ea   : > { %v1754_v23 = vadd.f32 %v1748_v21, %v1738_v20 }
 0x3ec   : > { %1759 = vst.msk [vmem:[#allocation3 + $0x10] sm:$0xff] %vm311_vm2, %v1754_v23 }
 0x3ed   : > { %v1751_v25 = vpop.xlane.xlu1 %1750 }
 0x3ee   : > { %v1755_v26 = vadd.f32 %v1751_v25, %v1739_v24 }
 0x3f0   : > { %1760 = vst.msk [vmem:[#allocation3 + $0x18] sm:$0xff] %vm311_vm2, %v1755_v26 }
 0x3f1   : > { %v2060_v33 = vpop.permute.xlu1 %2059 }
 0x3f2   : > { %v2077_v34 = vmul.f32 %v2060_v33, %v2053_v32 }
 0x3f3   : > { %v2098_v28 = vld [vmem:[#allocation3 + $0x10] sm:$0xff] }
 0x3f4   : > { %3648 = vrcp.f32 %v2098_v28 }
 0x3f7   : > { %v2099_v29 = vld [vmem:[#allocation3 + $0x18] sm:$0xff] }
 0x3f8   : > { %3650 = vrcp.f32 %v2099_v29 }
 0x3fe   : > { %v3649_v30 = vpop.eup %3648 }
 0x3ff   : > { %2120 = vperm.xlu1 %3627, %v3649_v30  }
 0x402   : > { %v3651_v31 = vpop.eup %3650 }
 0x403   : > { %2125 = vperm.xlu0 %3626, %v3651_v31  }
 0x40e   : > { %v1830_v37 = vpop.f32.mrb[12].mxu0 }
 0x40f   : > { %v2081_v38 = vadd.f32 %v2077_v34, %v1830_v37  ;;  %v3236_v39 = vpop.f32.mrb[13].mxu0 }
 0x411   : > { %2085 = vst.msk [vmem:[#allocation4] sm:$0xff] %vm320_vm1, %v2081_v38 }
 0x412   : > { %v1903_v41 = vpop.f32.mrb[20].mxu1 }
 0x413   : > { %v2082_v42 = vadd.f32 %v2078_v40, %v1903_v41  ;;  %v3241_v43 = vpop.f32.mrb[21].mxu1 }
 0x415   : > { %2086 = vst.msk [vmem:[#allocation4 + $0x8] sm:$0xff] %vm320_vm1, %v2082_v42 }
 0x418   : > { %v2104_v53 = vld [vmem:[#allocation4] sm:$0xff] }
 0x41c   : > { %v2105_v19 = vld [vmem:[#allocation4 + $0x8] sm:$0xff] }
 0x42e   : > { %v1976_v46 = vpop.f32.mrb[14].mxu0 }
 0x42f   : > { %v3246_v47 = vpop.f32.mrb[15].mxu0 }
 0x432   : > { %v2049_v49 = vpop.f32.mrb[22].mxu1 }
 0x433   : > { %v2084_v50 = vadd.f32 %v2080_v48, %v2049_v49  ;;  %v3251_v51 = vpop.f32.mrb[23].mxu1 }
 0x435   : > { %2088 = vst.msk [vmem:[#allocation4 + $0x18] sm:$0xff] %vm320_vm1, %v2084_v50 }
 0x43c   : > { %v2107_v5 = vld [vmem:[#allocation4 + $0x18] sm:$0xff] }
 0x45e   : > { %v2111_v52 = vpop.permute.xlu1 %2110 }
 0x45f   : > { %v2128_v54 = vmul.f32 %v2111_v52, %v2104_v53 }
 0x461   : > { %3255 = vmatmul.mubr.msk.f32.vlgmr.msra.gmra.mrb[16].mxu0 %vm320_vm1, %v2128_v54 }
 0x462   : > { %v2070_v57 = vpop.permute.xlu1 %2069  ;;  %3258 = vmatpush3.msra.mxu0 %v2133_v55  ;;  %3259 = vmatprep.mubr.msk.f32.mxu0 %vm3733_vm0, %v3734_v10 }
 0x463   : > { %v2079_v58 = vmul.f32 %v2070_v57, %v2055_v56  ;;  %3262 = vmatprep.subr.mxu0 %v3734_v10 }
 0x465   : > { %v2083_v59 = vadd.f32 %v2079_v58, %v1976_v46 }
 0x466   : > { %v2116_v60 = vpop.permute.xlu1 %2115 }
 0x467   : > { %2087 = vst.msk [vmem:[#allocation4 + $0x10] sm:$0xff] %vm320_vm1, %v2083_v59  ;;  %v2129_v61 = vmul.f32 %v2116_v60, %v2105_v19 }
 0x469   : > { %3260 = vmatmul.mubr.msk.f32.vlgmr.msra.gmra.mrb[16].mxu0 %vm320_vm1, %v2129_v61 }
 0x46a   : > { %3263 = vmatpush3.msra.mxu0 %v2134_v62  ;;  %3264 = vmatprep.mubr.msk.f32.mxu0 %vm3733_vm0, %v3734_v10 }
 0x46b   : > { %3267 = vmatprep.subr.mxu0 %v3734_v10 }
 0x46e   : > { %v2106_v0 = vld [vmem:[#allocation4 + $0x10] sm:$0xff] }
 0x47e   : > { %v2121_v63 = vpop.permute.xlu1 %2120 }
 0x47f   : > { %v2130_v1 = vmul.f32 %v2121_v63, %v2106_v0 }
 0x481   : > { %3265 = vmatmul.mubr.msk.f32.vlgmr.msra.gmra.mrb[16].mxu0 %vm320_vm1, %v2130_v1 }
 0x482   : > { %3268 = vmatpush3.msra.mxu0 %v2135_v2  ;;  %3269 = vmatprep.mubr.msk.f32.mxu0 %vm3733_vm0, %v3734_v10  ;;  %v2126_v4 = vpop.permute.xlu0 %2125 }
 0x483   : > { %v2131_v6 = vmul.f32 %v2126_v4, %v2107_v5 }
 0x489   : > { %3270 = vmatmul.mubr.msk.f32.vlgmr.msra.gmra.mrb[16].mxu0 %vm320_vm1, %v2131_v6 }
 0x55c   : > { %v2424_v10 = vpop.f32.mrb[16].mxu0 }
 0x55d   : > { %2431 = vst [vmem:[%s292_s15] sm:$0xff] %v2424_v10  ;;  %v3271_v7 = vpop.f32.mrb[17].mxu0 }
 0x55e   : > { %3665 = shalt.err (!%p3662_p5)
}
 0x55f   : > { %s3666_s13 = scalar_lea.hbm %s4701_s20, 128  ;;  %s3670_s11 = scalar_lea.hbm %s4752_s6, 256 }
 0x560   : > { %p3667_p6 = scmp.ne.s32.totalorder %s4701_s20, %s3666_s13  ;;  %p3671_p10 = scmp.lt.u32.totalorder %s4701_s20, %s4752_s6 }
 0x561   : > { %p3672_p11 = scmp.lt.u32.totalorder %s3670_s11, %s3666_s13  ;;  %p3674_p13 = scmp.lt.u32.totalorder %s3666_s13, %s4701_s20 }
 0x562   : > { %p3668_p7 = pnand %p3667_p6, %p3813_p4 }
 0x563   : > { %p3673_p12 = por %p3672_p11, %p3671_p10 }
 0x564   : > { %p3669_p9 = pneg %p3668_p7 }
 0x565   : > { %p3675_p0 = por %p3674_p13, %p3673_p12 }
 0x567   : > { %p3676_p1 = pnand %p3675_p0, %p3669_p9 }
 0x569   : > { %3679 = shalt.err (!%p3676_p1)
}
 0x56a   : > { %3566 = dma.vmem_to_hbm [thread:$0]  (%p3813_p4), %s4696_s16, 128, %s4701_s20, %s2433_s27  }
 0x56b PF: > { %p3572_p2 = scmp.ge.s32.totalorder %s3730_s26, 2  ;;  %s2459_s18 = sand.u32 1, %s3710_s21  }
 0x56c   : > { %s2460_s19 = scalar_lea.sflag [#allocation6], %s2459_s18 }
 0x56d   : > { %p3569_p3 = pnand %p3572_p2, %p3820_p8 }
 0x56f   : > { %3705 = dma.done.wait (!%p3569_p3), %s2460_s19, 128  }
 0x570   : > { %3707 = vsyncadd (!%p3569_p3), %s2460_s19, 4294967168  ;;  %s19_s26 = sadd.s32 1, %s3730_s26   ;;  %s4755_s21 = smov %s3714_s22 }
 0x571   : > { %p16_p5 = scmp.ge.s32.totalorder %s19_s26, 4   ;;  %s4756_s22 = smov %s3718_s23 }
 0x572   : > { %s4757_s23 = smov %s3826_s10  ;;  %s4758_s24 = smov %s3726_s25 }
 0x573   : > { %s4759_s25 = smov %s4761_s29  ;;  %18 = sbr.rel (!%p16_p5) target bundleno = 4 (0x4), region = 90 }
 0x57a   :  { %2465 = vsyncpa [#allocation6], 1 }
 0x57b   :  { %2467 = vsyncpa [#allocation6 + $0x1], 1 }

</bundles_post_ra>
